<compile_context>
chip_gen: v5e
topology: v5e:2x2
jax: 0.10.0
libtpu: 0.0.40
codegen_flags: <defaults>
</compile_context>

<pallas_src>
import functools

import jax
import jax.numpy as jnp
from jax import lax
from jax.experimental import pallas as pl
from jax.experimental.pallas import tpu as pltpu


def _cross_attn_kernel(x_ref, y_ref, w_ref, woutb_ref, o_ref, acc_ref,
                       *, heads, dim_head, scale):
    # Refs (per grid step == one batch block):
    #   x_ref    : (Bb, C, Nx)        query-source tokens (channel-first)
    #   y_ref    : (Bb, C, Ny)        key/value-source tokens
    #   w_ref    : (3*hidden, C)      fused QKV 1x1-conv weight
    #   woutb_ref: (C, hidden+1)      [to_out weight | to_out bias]
    #   o_ref    : (Bb, C, Nx)
    #   acc_ref  : (hidden, Bb*Nx)    f32 VMEM scratch for per-head outputs
    bb, c, nx = x_ref.shape
    ny = y_ref.shape[2]
    hidden = heads * dim_head
    f32 = jnp.float32
    bf16 = jnp.bfloat16

    def to_cn(a):  # (Bb, C, N) -> (C, Bb*N); lane-tile-aligned concat (N % 128 == 0)
        if a.shape[0] == 1:
            return a[0]
        return jnp.concatenate([a[i] for i in range(a.shape[0])], axis=-1)

    # Projections as one wide W @ X dot per block; bf16 operands, f32 accumulate.
    x_all = to_cn(x_ref[...]).astype(bf16)                    # (C, Bb*Nx)
    y_all = to_cn(y_ref[...]).astype(bf16)                    # (C, Bb*Ny)
    w = w_ref[...].astype(bf16)                               # (3*hidden, C)
    wq, wkv = w[:hidden], w[hidden:]                          # aligned sublane slices

    q_all = jnp.dot(wq, x_all, preferred_element_type=f32)    # (hidden,   Bb*Nx)
    kv_all = jnp.dot(wkv, y_all, preferred_element_type=f32)  # (2*hidden, Bb*Ny)
    k_all = kv_all[:hidden]
    v_all = kv_all[hidden:]

    wout = woutb_ref[:, :hidden].astype(bf16)                 # (C, hidden)
    bout = woutb_ref[:, hidden:hidden + 1].astype(f32)        # (C, 1)

    eps = 1e-12
    for i in range(bb):
        qb = q_all[:, i * nx:(i + 1) * nx]                    # (hidden, Nx) f32
        kb = k_all[:, i * ny:(i + 1) * ny]                    # (hidden, Ny) f32
        vb = v_all[:, i * ny:(i + 1) * ny]                    # (hidden, Ny) f32

        # l2norm over the *spatial* axis (== F.normalize(t, dim=-1) on
        # 'b h d (x y)'); rsqrt goes to the EUP.  The attention scale is
        # absorbed into q (cheaper than scaling the (Ny, Nx) score matrix).
        qb = qb * (lax.rsqrt(jnp.maximum(jnp.sum(qb * qb, axis=-1, keepdims=True),
                                         eps * eps)) * scale)
        kb = kb * lax.rsqrt(jnp.maximum(jnp.sum(kb * kb, axis=-1, keepdims=True),
                                        eps * eps))
        qb = qb.astype(bf16)
        kb = kb.astype(bf16)
        vb = vb.astype(bf16)

        for h in range(heads):
            sl = slice(h * dim_head, (h + 1) * dim_head)      # aligned (d = 32)
            qh, kh, vh = qb[sl], kb[sl], vb[sl]

            # simT[j, i] = sum_d k[d, j] * q[d, i]  -> (Ny, Nx): only the small
            # (d, Ny) operand needs a transposed MXU feed; the softmax tile is
            # fully lane-dense on Nx.
            simT = lax.dot_general(kh, qh, (((0,), (0,)), ((), ())),
                                   preferred_element_type=f32)
            # Logits are not bounded by `scale` (l2norm is over spatial, not d),
            # so keep max-subtraction for stability.
            simT = simT - jnp.max(simT, axis=0, keepdims=True)
            p = jnp.exp(simT)                                  # (Ny, Nx) f32
            denom = jnp.sum(p, axis=0, keepdims=True)          # (1, Nx)

            # Deferred normalization: un-normalized V @ P (natural matmul),
            # then scale by 1/denom broadcast over the d sublanes.
            out_un = jnp.dot(vh, p.astype(bf16), preferred_element_type=f32)
            acc_ref[sl, i * nx:(i + 1) * nx] = (
                out_un * pl.reciprocal(denom, approx=True))

    # to_out 1x1 conv + bias as one wide dot over the whole batch block;
    # output stores are lane-dense (N last).
    o_all = jnp.dot(wout, acc_ref[...].astype(bf16),
                    preferred_element_type=f32) + bout         # (C, Bb*Nx)
    for i in range(bb):
        o_ref[i] = o_all[:, i * nx:(i + 1) * nx].astype(o_ref.dtype)


def _tensorcores_per_device():
    """Best-effort TC count per device: v4 / v5p / v7x expose 2 (megacore)."""
    try:
        kind = jax.devices()[0].device_kind.lower()
    except Exception:
        return 1
    return 2 if any(t in kind for t in ("v4", "v5p", "v7")) else 1


def cross_attention_lucas(x_nchw, y_nchw, w_qkv, w_out, b_out,
                          *, heads=1, dim_head=32, scale=10,
                          num_batch_blocks=None):
    b, c, H, W = x_nchw.shape
    _, _, Hy, Wy = y_nchw.shape
    Nx, Ny = H * W, Hy * Wy
    hidden = heads * dim_head

    # Grid strategy: collapse the batch grid on single-TC chips (v5e/v6e) so we
    # pay one grid-step overhead and get wider projection dots; keep >= 2
    # parallel blocks on 2-TC chips so megacore splits the work.
    if num_batch_blocks is None:
        num_batch_blocks = _tensorcores_per_device()
    num_batch_blocks = max(1, min(int(num_batch_blocks), b))
    while b % num_batch_blocks:
        num_batch_blocks -= 1
    bb = b // num_batch_blocks

    # Channel-first token layout: NCHW -> (B, C, N) is a pure reshape.
    x_tok = x_nchw.reshape(b, c, Nx)
    y_tok = y_nchw.reshape(b, c, Ny)

    # Packed weights: one full QKV matrix (Q rows used with x, K/V rows with y)
    # and one [w_out | b_out] slab -> only two weight operands / DMAs.
    w = w_qkv.reshape(3 * hidden, c)
    woutb = jnp.concatenate([w_out.reshape(c, hidden), b_out.reshape(c, 1)],
                            axis=-1)                           # (C, hidden+1)

    kernel = functools.partial(_cross_attn_kernel,
                               heads=heads, dim_head=dim_head,
                               scale=float(scale))

    # TODO(synk): for large Nx/Ny an Nx-tiled grid + online softmax (with a
    # pre-pass for the spatial L2-norm statistics) is needed to bound VMEM,
    # especially on v7x (64 MiB); at these shapes everything fits easily.
    out_tok = pl.pallas_call(
        kernel,
        out_shape=jax.ShapeDtypeStruct((b, c, Nx), x_tok.dtype),
        grid=(num_batch_blocks,),
        in_specs=[
            pl.BlockSpec((bb, c, Nx), lambda i: (i, 0, 0)),
            pl.BlockSpec((bb, c, Ny), lambda i: (i, 0, 0)),
            pl.BlockSpec((3 * hidden, c), lambda i: (0, 0)),
            pl.BlockSpec((c, hidden + 1), lambda i: (0, 0)),
        ],
        out_specs=pl.BlockSpec((bb, c, Nx), lambda i: (i, 0, 0)),
        scratch_shapes=[pltpu.VMEM((hidden, bb * Nx), jnp.float32)],
        compiler_params=pltpu.CompilerParams(dimension_semantics=("parallel",)),
    )(x_tok, y_tok, w, woutb)

    return out_tok.reshape(b, c, H, W)


def _reference(x, y, w_qkv, w_out, b_out, *, heads, dim_head, scale):
    """Pure-JAX (f32) mirror of the PyTorch forward, for correctness checking."""
    b, c, H, W = x.shape
    _, _, Hy, Wy = y.shape
    hidden = heads * dim_head
    wq = w_qkv.reshape(3 * hidden, c)
    qkv_x = jnp.einsum('oc,bchw->bohw', wq, x).reshape(b, 3, heads, dim_head, H * W)
    qkv_y = jnp.einsum('oc,bchw->bohw', wq, y).reshape(b, 3, heads, dim_head, Hy * Wy)
    q = qkv_x[:, 0]                      # (b, h, d, Nx)
    k = qkv_y[:, 1]                      # (b, h, d, Ny)
    v = qkv_y[:, 2]                      # (b, h, d, Ny)
    l2 = lambda t: t / jnp.maximum(jnp.linalg.norm(t, axis=-1, keepdims=True), 1e-12)
    q, k = l2(q), l2(k)
    sim = jnp.einsum('bhdi,bhdj->bhij', q, k) * scale
    attn = jax.nn.softmax(sim, axis=-1)
    out = jnp.einsum('bhij,bhdj->bhid', attn, v)                     # (b, h, Nx, d)
    out = jnp.transpose(out, (0, 1, 3, 2)).reshape(b, hidden, H, W)  # 'b (h d) x y'
    return (jnp.einsum('oc,bchw->bohw', w_out.reshape(c, hidden), out)
            + b_out[None, :, None, None])


if __name__ == "__main__":
    B, C, H, W = 2, 4, 16, 16
    Hy, Wy = 8, 8

    key = jax.random.PRNGKey(0)
    ks = jax.random.split(key, 4)
    x = jax.random.normal(ks[0], (B, C, H, W), jnp.float32)
    y = jax.random.normal(ks[1], (B, C, Hy, Wy), jnp.float32)

    def check(heads, dim_head, scale, wkey, num_batch_blocks=None):
        hidden = heads * dim_head
        k3, k4, k5 = jax.random.split(wkey, 3)
        w_qkv = jax.random.normal(k3, (3 * hidden, C, 1, 1), jnp.float32) * 0.1
        w_out = jax.random.normal(k4, (C, hidden, 1, 1), jnp.float32) * 0.1
        b_out = jax.random.normal(k5, (C,), jnp.float32) * 0.1

        out = cross_attention_lucas(x, y, w_qkv, w_out, b_out,
                                    heads=heads, dim_head=dim_head, scale=scale,
                                    num_batch_blocks=num_batch_blocks)
        out = jax.block_until_ready(out)
        ref = _reference(x, y, w_qkv, w_out, b_out,
                         heads=heads, dim_head=dim_head, scale=scale)
        assert out.shape == ref.shape
        err = float(jnp.max(jnp.abs(out - ref)))
        # bf16 MXU operands (f32 accumulate) + EUP approx reciprocal vs a pure
        # f32 reference: observed error is O(1e-3) at these magnitudes.
        assert err < 2e-2, (f"mismatch (heads={heads}, blocks={num_batch_blocks}): "
                            f"max abs err = {err}")

    # Exercise both grid paths explicitly (collapsed = v5e/v6e, split = v7x
    # megacore) plus the heads > 1 path with the auto-detected grid.
    check(1, 32, 10, ks[2], num_batch_blocks=1)
    check(1, 32, 10, ks[2], num_batch_blocks=2)
    check(2, 32, 10, ks[3])

    print("KERNEL_OK")
</pallas_src>

<mosaic_0001>
module attributes {stable_mosaic.version = 11 : i64} {
  func.func @_cross_attn_kernel(%arg0: i32, %arg1: memref<2x4x256xf32, #tpu.memory_space<vmem>>, %arg2: memref<2x4x64xf32, #tpu.memory_space<vmem>>, %arg3: memref<96x4xf32, #tpu.memory_space<vmem>>, %arg4: memref<4x33xf32, #tpu.memory_space<vmem>>, %arg5: memref<2x4x256xf32, #tpu.memory_space<vmem>>, %arg6: memref<32x512xf32, #tpu.memory_space<vmem>>) attributes {dimension_semantics = [#tpu.dimension_semantics<parallel>], iteration_bounds = array<i64: 1>, scalar_prefetch = 0 : i64, scratch_operands = 1 : i64, tpu.core_type = #tpu.core_type<tc>, window_params = [{transform_indices = @transform_0, window_bounds = array<i64: 2, 4, 256>}, {transform_indices = @transform_1, window_bounds = array<i64: 2, 4, 64>}, {pipeline_mode = #tpu.pipeline_mode<synchronous>, transform_indices = @transform_2, window_bounds = array<i64: 96, 4>}, {pipeline_mode = #tpu.pipeline_mode<synchronous>, transform_indices = @transform_3, window_bounds = array<i64: 4, 33>}, {transform_indices = @transform_4, window_bounds = array<i64: 2, 4, 256>}]} {
    %c0 = arith.constant 0 : index
    %c0_0 = arith.constant 0 : index
    %c0_1 = arith.constant 0 : index
    %0 = vector.load %arg1[%c0, %c0_0, %c0_1] : memref<2x4x256xf32, #tpu.memory_space<vmem>>, vector<2x4x256xf32>
    %1 = vector.extract_strided_slice %0 {offsets = [0, 0, 0], sizes = [1, 4, 256], strides = [1, 1, 1]} : vector<2x4x256xf32> to vector<1x4x256xf32>
    %2 = vector.shape_cast %1 : vector<1x4x256xf32> to vector<4x256xf32>
    %3 = vector.extract_strided_slice %0 {offsets = [1, 0, 0], sizes = [1, 4, 256], strides = [1, 1, 1]} : vector<2x4x256xf32> to vector<1x4x256xf32>
    %4 = vector.shape_cast %3 : vector<1x4x256xf32> to vector<4x256xf32>
    %5 = tpu.concatenate %2, %4 in 1 : vector<4x256xf32>, vector<4x256xf32> -> vector<4x512xf32>
    %6 = arith.truncf %5 : vector<4x512xf32> to vector<4x512xbf16>
    %c0_2 = arith.constant 0 : index
    %c0_3 = arith.constant 0 : index
    %c0_4 = arith.constant 0 : index
    %7 = vector.load %arg2[%c0_2, %c0_3, %c0_4] : memref<2x4x64xf32, #tpu.memory_space<vmem>>, vector<2x4x64xf32>
    %8 = vector.extract_strided_slice %7 {offsets = [0, 0, 0], sizes = [1, 4, 64], strides = [1, 1, 1]} : vector<2x4x64xf32> to vector<1x4x64xf32>
    %9 = vector.shape_cast %8 : vector<1x4x64xf32> to vector<4x64xf32>
    %10 = vector.extract_strided_slice %7 {offsets = [1, 0, 0], sizes = [1, 4, 64], strides = [1, 1, 1]} : vector<2x4x64xf32> to vector<1x4x64xf32>
    %11 = vector.shape_cast %10 : vector<1x4x64xf32> to vector<4x64xf32>
    %12 = tpu.concatenate %9, %11 in 1 : vector<4x64xf32>, vector<4x64xf32> -> vector<4x128xf32>
    %13 = arith.truncf %12 : vector<4x128xf32> to vector<4x128xbf16>
    %c0_5 = arith.constant 0 : index
    %c0_6 = arith.constant 0 : index
    %14 = vector.load %arg3[%c0_5, %c0_6] : memref<96x4xf32, #tpu.memory_space<vmem>>, vector<96x4xf32>
    %15 = arith.truncf %14 : vector<96x4xf32> to vector<96x4xbf16>
    %16 = vector.extract_strided_slice %15 {offsets = [0, 0], sizes = [32, 4], strides = [1, 1]} : vector<96x4xbf16> to vector<32x4xbf16>
    %17 = vector.extract_strided_slice %15 {offsets = [32, 0], sizes = [64, 4], strides = [1, 1]} : vector<96x4xbf16> to vector<64x4xbf16>
    %cst = arith.constant dense<0.000000e+00> : vector<32x512xf32>
    %18 = tpu.matmul %16, %6, %cst {dimension_numbers = #tpu.dot_dimension_numbers<[1], [0], [0], [1], [0, 0, 1, 1], [], []>} : vector<32x4xbf16>, vector<4x512xbf16>, vector<32x512xf32> -> vector<32x512xf32>
    %cst_7 = arith.constant dense<0.000000e+00> : vector<64x128xf32>
    %19 = tpu.matmul %17, %13, %cst_7 {dimension_numbers = #tpu.dot_dimension_numbers<[1], [0], [0], [1], [0, 0, 1, 1], [], []>} : vector<64x4xbf16>, vector<4x128xbf16>, vector<64x128xf32> -> vector<64x128xf32>
    %20 = vector.extract_strided_slice %19 {offsets = [0, 0], sizes = [32, 128], strides = [1, 1]} : vector<64x128xf32> to vector<32x128xf32>
    %21 = vector.extract_strided_slice %19 {offsets = [32, 0], sizes = [32, 128], strides = [1, 1]} : vector<64x128xf32> to vector<32x128xf32>
    %c0_8 = arith.constant 0 : index
    %c0_9 = arith.constant 0 : index
    %22 = vector.load %arg4[%c0_8, %c0_9] : memref<4x33xf32, #tpu.memory_space<vmem>>, vector<4x32xf32>
    %23 = arith.truncf %22 : vector<4x32xf32> to vector<4x32xbf16>
    %c0_10 = arith.constant 0 : index
    %c32 = arith.constant 32 : index
    %24 = vector.load %arg4[%c0_10, %c32] : memref<4x33xf32, #tpu.memory_space<vmem>>, vector<4x1xf32>
    %25 = vector.extract_strided_slice %18 {offsets = [0, 0], sizes = [32, 256], strides = [1, 1]} : vector<32x512xf32> to vector<32x256xf32>
    %26 = vector.extract_strided_slice %20 {offsets = [0, 0], sizes = [32, 64], strides = [1, 1]} : vector<32x128xf32> to vector<32x64xf32>
    %27 = vector.extract_strided_slice %21 {offsets = [0, 0], sizes = [32, 64], strides = [1, 1]} : vector<32x128xf32> to vector<32x64xf32>
    %28 = arith.mulf %25, %25 : vector<32x256xf32>
    %cst_11 = arith.constant dense<0.000000e+00> : vector<32xf32>
    %29 = vector.multi_reduction <add>, %28, %cst_11 [1] : vector<32x256xf32> to vector<32xf32>
    %30 = vector.shape_cast %29 : vector<32xf32> to vector<32x1xf32>
    %cst_12 = arith.constant 1.000000e-24 : f32
    %31 = vector.broadcast %cst_12 : f32 to vector<32x1xf32>
    %32 = arith.maximumf %30, %31 : vector<32x1xf32>
    %33 = math.rsqrt %32 : vector<32x1xf32>
    %cst_13 = arith.constant 1.000000e+01 : f32
    %34 = vector.broadcast %cst_13 : f32 to vector<32x1xf32>
    %35 = arith.mulf %33, %34 : vector<32x1xf32>
    %36 = vector.broadcast %35 : vector<32x1xf32> to vector<32x256xf32>
    %37 = arith.mulf %25, %36 : vector<32x256xf32>
    %38 = arith.mulf %26, %26 : vector<32x64xf32>
    %cst_14 = arith.constant dense<0.000000e+00> : vector<32xf32>
    %39 = vector.multi_reduction <add>, %38, %cst_14 [1] : vector<32x64xf32> to vector<32xf32>
    %40 = vector.shape_cast %39 : vector<32xf32> to vector<32x1xf32>
    %cst_15 = arith.constant 1.000000e-24 : f32
    %41 = vector.broadcast %cst_15 : f32 to vector<32x1xf32>
    %42 = arith.maximumf %40, %41 : vector<32x1xf32>
    %43 = math.rsqrt %42 : vector<32x1xf32>
    %44 = vector.broadcast %43 : vector<32x1xf32> to vector<32x64xf32>
    %45 = arith.mulf %26, %44 : vector<32x64xf32>
    %46 = arith.truncf %37 : vector<32x256xf32> to vector<32x256xbf16>
    %47 = arith.truncf %45 : vector<32x64xf32> to vector<32x64xbf16>
    %48 = arith.truncf %27 : vector<32x64xf32> to vector<32x64xbf16>
    %cst_16 = arith.constant dense<0.000000e+00> : vector<64x256xf32>
    %49 = tpu.matmul %47, %46, %cst_16 {dimension_numbers = #tpu.dot_dimension_numbers<[0], [0], [1], [1], [0, 1, 1, 1], [], []>} : vector<32x64xbf16>, vector<32x256xbf16>, vector<64x256xf32> -> vector<64x256xf32>
    %cst_17 = arith.constant dense<0xFF800000> : vector<256xf32>
    %50 = vector.multi_reduction <maximumf>, %49, %cst_17 [0] : vector<64x256xf32> to vector<256xf32>
    %51 = vector.shape_cast %50 : vector<256xf32> to vector<1x256xf32>
    %52 = vector.broadcast %51 : vector<1x256xf32> to vector<64x256xf32>
    %53 = arith.subf %49, %52 : vector<64x256xf32>
    %54 = math.exp %53 : vector<64x256xf32>
    %cst_18 = arith.constant dense<0.000000e+00> : vector<256xf32>
    %55 = vector.multi_reduction <add>, %54, %cst_18 [0] : vector<64x256xf32> to vector<256xf32>
    %56 = vector.shape_cast %55 : vector<256xf32> to vector<1x256xf32>
    %57 = arith.truncf %54 : vector<64x256xf32> to vector<64x256xbf16>
    %cst_19 = arith.constant dense<0.000000e+00> : vector<32x256xf32>
    %58 = tpu.matmul %48, %57, %cst_19 {dimension_numbers = #tpu.dot_dimension_numbers<[1], [0], [0], [1], [0, 0, 1, 1], [], []>} : vector<32x64xbf16>, vector<64x256xbf16>, vector<32x256xf32> -> vector<32x256xf32>
    %59 = tpu.reciprocal %56 {approx = true} : vector<1x256xf32> -> vector<1x256xf32>
    %60 = vector.broadcast %59 : vector<1x256xf32> to vector<32x256xf32>
    %61 = arith.mulf %58, %60 : vector<32x256xf32>
    %c0_20 = arith.constant 0 : index
    %c0_21 = arith.constant 0 : index
    %62 = vector.load %arg6[%c0_20, %c0_21] : memref<32x512xf32, #tpu.memory_space<vmem>>, vector<32x256xf32>
    tpu.vector_store %arg6[%c0_20, %c0_21], %61 {strides = array<i32>} : memref<32x512xf32, #tpu.memory_space<vmem>>, vector<32x256xf32>,
    %63 = vector.extract_strided_slice %18 {offsets = [0, 256], sizes = [32, 256], strides = [1, 1]} : vector<32x512xf32> to vector<32x256xf32>
    %64 = vector.extract_strided_slice %20 {offsets = [0, 64], sizes = [32, 64], strides = [1, 1]} : vector<32x128xf32> to vector<32x64xf32>
    %65 = vector.extract_strided_slice %21 {offsets = [0, 64], sizes = [32, 64], strides = [1, 1]} : vector<32x128xf32> to vector<32x64xf32>
    %66 = arith.mulf %63, %63 : vector<32x256xf32>
    %cst_22 = arith.constant dense<0.000000e+00> : vector<32xf32>
    %67 = vector.multi_reduction <add>, %66, %cst_22 [1] : vector<32x256xf32> to vector<32xf32>
    %68 = vector.shape_cast %67 : vector<32xf32> to vector<32x1xf32>
    %cst_23 = arith.constant 1.000000e-24 : f32
    %69 = vector.broadcast %cst_23 : f32 to vector<32x1xf32>
    %70 = arith.maximumf %68, %69 : vector<32x1xf32>
    %71 = math.rsqrt %70 : vector<32x1xf32>
    %cst_24 = arith.constant 1.000000e+01 : f32
    %72 = vector.broadcast %cst_24 : f32 to vector<32x1xf32>
    %73 = arith.mulf %71, %72 : vector<32x1xf32>
    %74 = vector.broadcast %73 : vector<32x1xf32> to vector<32x256xf32>
    %75 = arith.mulf %63, %74 : vector<32x256xf32>
    %76 = arith.mulf %64, %64 : vector<32x64xf32>
    %cst_25 = arith.constant dense<0.000000e+00> : vector<32xf32>
    %77 = vector.multi_reduction <add>, %76, %cst_25 [1] : vector<32x64xf32> to vector<32xf32>
    %78 = vector.shape_cast %77 : vector<32xf32> to vector<32x1xf32>
    %cst_26 = arith.constant 1.000000e-24 : f32
    %79 = vector.broadcast %cst_26 : f32 to vector<32x1xf32>
    %80 = arith.maximumf %78, %79 : vector<32x1xf32>
    %81 = math.rsqrt %80 : vector<32x1xf32>
    %82 = vector.broadcast %81 : vector<32x1xf32> to vector<32x64xf32>
    %83 = arith.mulf %64, %82 : vector<32x64xf32>
    %84 = arith.truncf %75 : vector<32x256xf32> to vector<32x256xbf16>
    %85 = arith.truncf %83 : vector<32x64xf32> to vector<32x64xbf16>
    %86 = arith.truncf %65 : vector<32x64xf32> to vector<32x64xbf16>
    %cst_27 = arith.constant dense<0.000000e+00> : vector<64x256xf32>
    %87 = tpu.matmul %85, %84, %cst_27 {dimension_numbers = #tpu.dot_dimension_numbers<[0], [0], [1], [1], [0, 1, 1, 1], [], []>} : vector<32x64xbf16>, vector<32x256xbf16>, vector<64x256xf32> -> vector<64x256xf32>
    %cst_28 = arith.constant dense<0xFF800000> : vector<256xf32>
    %88 = vector.multi_reduction <maximumf>, %87, %cst_28 [0] : vector<64x256xf32> to vector<256xf32>
    %89 = vector.shape_cast %88 : vector<256xf32> to vector<1x256xf32>
    %90 = vector.broadcast %89 : vector<1x256xf32> to vector<64x256xf32>
    %91 = arith.subf %87, %90 : vector<64x256xf32>
    %92 = math.exp %91 : vector<64x256xf32>
    %cst_29 = arith.constant dense<0.000000e+00> : vector<256xf32>
    %93 = vector.multi_reduction <add>, %92, %cst_29 [0] : vector<64x256xf32> to vector<256xf32>
    %94 = vector.shape_cast %93 : vector<256xf32> to vector<1x256xf32>
    %95 = arith.truncf %92 : vector<64x256xf32> to vector<64x256xbf16>
    %cst_30 = arith.constant dense<0.000000e+00> : vector<32x256xf32>
    %96 = tpu.matmul %86, %95, %cst_30 {dimension_numbers = #tpu.dot_dimension_numbers<[1], [0], [0], [1], [0, 0, 1, 1], [], []>} : vector<32x64xbf16>, vector<64x256xbf16>, vector<32x256xf32> -> vector<32x256xf32>
    %97 = tpu.reciprocal %94 {approx = true} : vector<1x256xf32> -> vector<1x256xf32>
    %98 = vector.broadcast %97 : vector<1x256xf32> to vector<32x256xf32>
    %99 = arith.mulf %96, %98 : vector<32x256xf32>
    %c0_31 = arith.constant 0 : index
    %c256 = arith.constant 256 : index
    %100 = vector.load %arg6[%c0_31, %c256] : memref<32x512xf32, #tpu.memory_space<vmem>>, vector<32x256xf32>
    tpu.vector_store %arg6[%c0_31, %c256], %99 {strides = array<i32>} : memref<32x512xf32, #tpu.memory_space<vmem>>, vector<32x256xf32>,
    %c0_32 = arith.constant 0 : index
    %c0_33 = arith.constant 0 : index
    %101 = vector.load %arg6[%c0_32, %c0_33] : memref<32x512xf32, #tpu.memory_space<vmem>>, vector<32x512xf32>
    %102 = arith.truncf %101 : vector<32x512xf32> to vector<32x512xbf16>
    %cst_34 = arith.constant dense<0.000000e+00> : vector<4x512xf32>
    %103 = tpu.matmul %23, %102, %cst_34 {dimension_numbers = #tpu.dot_dimension_numbers<[1], [0], [0], [1], [0, 0, 1, 1], [], []>} : vector<4x32xbf16>, vector<32x512xbf16>, vector<4x512xf32> -> vector<4x512xf32>
    %104 = vector.broadcast %24 : vector<4x1xf32> to vector<4x512xf32>
    %105 = arith.addf %103, %104 : vector<4x512xf32>
    %106 = vector.extract_strided_slice %105 {offsets = [0, 0], sizes = [4, 256], strides = [1, 1]} : vector<4x512xf32> to vector<4x256xf32>
    %c0_35 = arith.constant 0 : index
    %c0_36 = arith.constant 0 : index
    %c0_37 = arith.constant 0 : index
    %107 = vector.load %arg5[%c0_35, %c0_36, %c0_37] : memref<2x4x256xf32, #tpu.memory_space<vmem>>, vector<1x4x256xf32>
    %108 = vector.shape_cast %107 : vector<1x4x256xf32> to vector<4x256xf32>
    %109 = vector.shape_cast %106 : vector<4x256xf32> to vector<1x4x256xf32>
    tpu.vector_store %arg5[%c0_35, %c0_36, %c0_37], %109 {strides = array<i32>} : memref<2x4x256xf32, #tpu.memory_space<vmem>>, vector<1x4x256xf32>,
    %110 = vector.extract_strided_slice %105 {offsets = [0, 256], sizes = [4, 256], strides = [1, 1]} : vector<4x512xf32> to vector<4x256xf32>
    %c1 = arith.constant 1 : index
    %c0_38 = arith.constant 0 : index
    %c0_39 = arith.constant 0 : index
    %111 = vector.load %arg5[%c1, %c0_38, %c0_39] : memref<2x4x256xf32, #tpu.memory_space<vmem>>, vector<1x4x256xf32>
    %112 = vector.shape_cast %111 : vector<1x4x256xf32> to vector<4x256xf32>
    %113 = vector.shape_cast %110 : vector<4x256xf32> to vector<1x4x256xf32>
    tpu.vector_store %arg5[%c1, %c0_38, %c0_39], %113 {strides = array<i32>} : memref<2x4x256xf32, #tpu.memory_space<vmem>>, vector<1x4x256xf32>,
    return
  }
  func.func @transform_0(%arg0: i32) -> (i32, i32, i32) {
    %c0_i32 = arith.constant 0 : i32
    %c0_i32_0 = arith.constant 0 : i32
    %c0_i32_1 = arith.constant 0 : i32
    return %arg0, %c0_i32, %c0_i32_0 : i32, i32, i32
  }
  func.func @transform_1(%arg0: i32) -> (i32, i32, i32) {
    %c0_i32 = arith.constant 0 : i32
    %c0_i32_0 = arith.constant 0 : i32
    %c0_i32_1 = arith.constant 0 : i32
    return %arg0, %c0_i32, %c0_i32_0 : i32, i32, i32
  }
  func.func @transform_2(%arg0: i32) -> (i32, i32) {
    %c0_i32 = arith.constant 0 : i32
    %c0_i32_0 = arith.constant 0 : i32
    %c0_i32_1 = arith.constant 0 : i32
    return %c0_i32, %c0_i32_0 : i32, i32
  }
  func.func @transform_3(%arg0: i32) -> (i32, i32) {
    %c0_i32 = arith.constant 0 : i32
    %c0_i32_0 = arith.constant 0 : i32
    %c0_i32_1 = arith.constant 0 : i32
    return %c0_i32, %c0_i32_0 : i32, i32
  }
  func.func @transform_4(%arg0: i32) -> (i32, i32, i32) {
    %c0_i32 = arith.constant 0 : i32
    %c0_i32_0 = arith.constant 0 : i32
    %c0_i32_1 = arith.constant 0 : i32
    return %arg0, %c0_i32, %c0_i32_0 : i32, i32, i32
  }
}

</mosaic_0001>

<bundles_post_ra>
// kernel: tpu_custom_call.1
= control target key start
LH: loop header
LB: loop body
LE: loop exit
PB: predicated region body
PF: predicated region fallthrough
CT: control target
= control target key end

     0   :  { %s1369_s19 = smov 64   ;;  %s1818_s0 = inlined_call_operand.vmem [shape: f32[2,4,256], index: 0, kind: input, shape index: {}]   ;;  %s1819_s1 = inlined_call_operand.vmem [shape: f32[2,4,64], index: 1, kind: input, shape index: {}]   ;;  %s1820_s2 = inlined_call_operand.vmem [shape: f32[96,4], index: 2, kind: input, shape index: {}]   ;;  %s1821_s3 = inlined_call_operand.vmem [shape: f32[4,33], index: 3, kind: input, shape index: {}]   ;;  %s1822_s4 = inlined_call_operand.hbm [shape: f32[2,4,256], index: 4, kind: output, shape index: {}]  }
   0x1   :  { %v38_v0 = vld [vmem:[%s1819_s1 + $0x4] sm:$0xf]  ;;  %v47_v3 = vld [vmem:[%s1820_s2 + $0x8] sm:$0xff] }
   0x2   :  { %v19_v1 = vld [vmem:[%s1818_s0] sm:$0xff]  ;;  %40 = vrot.lane.b32.xlu0 %v38_v0, %s1369_s19 }
   0x3   :  { %22 = vst [vmem:[#allocation1] ss:$2 sm:$0xff] %v19_v1  ;;  %v46_v2 = vld [vmem:[%s1820_s2] sm:$0xff] }
   0x4   :  { %9 = vsyncpa [#allocation4], 0  ;;  %v58_v4 = vpack.c.bf16 %v46_v2, %v46_v2  ;;  %v59_v5 = vpack.c.bf16 %v47_v3, %v47_v3  ;;  %v20_v6 = vld [vmem:[%s1818_s0 + $0x8] sm:$0xff]  ;;  %vm87_vm0 = vcmask 1041408   ;;  %vm80_vm1 = vcmask 31744   ;;  %v48_v16 = vld [vmem:[%s1820_s2 + $0x10] sm:$0xff] }
   0x5   :  { %v49_v17 = vld [vmem:[%s1820_s2 + $0x18] sm:$0xff]  ;;  %v60_v18 = vpack.c.bf16 %v48_v16, %v48_v16  ;;  %v50_v23 = vld [vmem:[%s1820_s2 + $0x20] sm:$0xff]  ;;  %v51_v24 = vld [vmem:[%s1820_s2 + $0x28] sm:$0xff]  ;;  %vm43_vm2 = vcmask 523264   ;;  %s1179_s24 = sshll.u32 %s1822_s4, 4  ;;  %s1372_s25 = smov 128   ;;  %s1180_s24 = int_to_ptr.hbm [resolvable:$true] %s1179_s24 }
   0x6   :  { %v74_v7 = vunpack.c.l.b16 %v58_v4  ;;  %v75_v8 = vunpack.c.l.b16 %v59_v5  ;;  %v61_v19 = vpack.c.bf16 %v49_v17, %v49_v17  ;;  %v62_v25 = vpack.c.bf16 %v50_v23, %v50_v23  ;;  %v37_v27 = vld [vmem:[%s1819_s1] sm:$0xf]  ;;  %v52_v41 = vld [vmem:[%s1820_s2 + $0x30] sm:$0xff]  ;;  %v53_v42 = vld [vmem:[%s1820_s2 + $0x38] sm:$0xff]  ;;  %s1373_s0 = smov 8  }
   0x7   :  { %v76_v20 = vunpack.c.l.b16 %v60_v18  ;;  %v63_v26 = vpack.c.bf16 %v51_v24, %v51_v24  ;;  %v64_v43 = vpack.c.bf16 %v52_v41, %v52_v41  ;;  %v65_v44 = vpack.c.bf16 %v53_v42, %v53_v42 }
   0x8   :  { %v78_v15 = vpack.c.b16 %v75_v8, %v74_v7  ;;  %v77_v21 = vunpack.c.l.b16 %v61_v19  ;;  %v184_v29 = vunpack.c.l.b16 %v62_v25 }
   0x9   :  { %v185_v30 = vunpack.c.l.b16 %v63_v26  ;;  %v186_v45 = vunpack.c.l.b16 %v64_v43  ;;  %v187_v46 = vunpack.c.l.b16 %v65_v44 }
   0xa   :  { %v23_v9 = vld.sshfl [vmem:[#allocation1] sm:$0xff pattern:$0x75316420]  ;;  %v24_v10 = vld.sshfl [vmem:[#allocation1 + $0x8] sm:$0xff pattern:$0x75316420]  ;;  %v79_v22 = vpack.c.b16 %v77_v21, %v76_v20 }
   0xb   :  { %v33_v11 = vpack.c.bf16 %v23_v9, %v23_v9  ;;  %28 = vst [vmem:[#allocation1] ss:$2 sm:$0xff] %v20_v6  ;;  %v34_v12 = vpack.c.bf16 %v24_v10, %v24_v10  ;;  %v192_v38 = vpack.c.b16 %v185_v30, %v184_v29  ;;  %v193_v47 = vpack.c.b16 %v187_v46, %v186_v45 }
   0xd   :  { %v89_v13 = vsel %vm87_vm0, %v33_v11, 0  ;;  %v92_v14 = vsel %vm87_vm0, %v34_v12, 0 }
   0xe   :  { %107 = vmatpush.bf16.msra.mxu0 %v89_v13  ;;  %126 = vmatpush.bf16.msra.mxu1 %v92_v14 }
  0x11   :  { %1191 = vmatmul.msk.bf16.vlgmr.msra.gmra.mxu0 %vm80_vm1, %v78_v15  ;;  %1193 = vmatmul.msk.bf16.vlgmr.msra.gmra.mxu1 %vm80_vm1, %v78_v15 }
  0x12   :  { %v29_v33 = vld.sshfl [vmem:[#allocation1] sm:$0xff pattern:$0x75316420]  ;;  %v30_v34 = vld.sshfl [vmem:[#allocation1 + $0x8] sm:$0xff pattern:$0x75316420] }
  0x13   :  { %v35_v35 = vpack.c.bf16 %v29_v33, %v29_v33  ;;  %v36_v36 = vpack.c.bf16 %v30_v34, %v30_v34 }
  0x15   :  { %v95_v39 = vsel %vm87_vm0, %v35_v35, 0  ;;  %v98_v40 = vsel %vm87_vm0, %v36_v36, 0 }
  0x16   :  { %145 = vmatpush.bf16.msra.mxu2 %v95_v39  ;;  %164 = vmatpush.bf16.msra.mxu3 %v98_v40 }
  0x19   :  { %1195 = vmatmul.msk.bf16.vlgmr.msra.gmra.mxu2 %vm80_vm1, %v78_v15  ;;  %1197 = vmatmul.msk.bf16.vlgmr.msra.gmra.mxu3 %vm80_vm1, %v78_v15 }
  0x21   :  { %1192 = vmatmul.msk.bf16.gmra.mxu0 %vm80_vm1, %v79_v22  ;;  %1194 = vmatmul.msk.bf16.gmra.mxu1 %vm80_vm1, %v79_v22 }
  0x29   :  { %1196 = vmatmul.msk.bf16.gmra.mxu2 %vm80_vm1, %v79_v22  ;;  %1198 = vmatmul.msk.bf16.gmra.mxu3 %vm80_vm1, %v79_v22 }
  0x74   :  { %v41_v28 = vpop.permute.xlu0 %40 }
  0x75   :  { %v44_v31 = vsel %vm43_vm2, %v37_v27, %v41_v28 }
  0x76   :  { %v45_v32 = vpack.c.bf16 %v44_v31, %v44_v31 }
  0x78   :  { %v209_v37 = vsel %vm87_vm0, %v45_v32, 0 }
  0x79   :  { %218 = vmatpush.bf16.msrb.mxu0 %v209_v37 }
  0x7c   :  { %1199 = vmatmul.msk.bf16.vlgmr.msrb.gmra.mxu0 %vm80_vm1, %v192_v38 }
  0x8c   :  { %1200 = vmatmul.msk.bf16.gmra.mxu0 %vm80_vm1, %v193_v47 }
  0x8e   :  { %v1452_v48 = vpop.f32.mrf.mxu0  ;;  %v1471_v57 = vpop.f32.mrf.mxu1 }
  0x8f   :  { %v242_v6 = vmul.f32 %v1452_v48, %v1452_v48  ;;  %v243_v7 = vmul.f32 %v1471_v57, %v1471_v57 }
  0x91   :  { %v250_v8 = vadd.f32 %v243_v7, %v242_v6 }
  0x96   :  { %v1454_v49 = vpop.f32.mrf.mxu0  ;;  %v1478_v60 = vpop.f32.mrf.mxu1 }
  0x97   :  { %v244_v13 = vmul.f32 %v1454_v49, %v1454_v49  ;;  %v245_v14 = vmul.f32 %v1478_v60, %v1478_v60 }
  0x99   :  { %v253_v15 = vadd.f32 %v245_v14, %v244_v13 }
  0x9c   :  { %v1508_v16 = vpop.f32.mrf.mxu2  ;;  %v1510_v17 = vpop.f32.mrf.mxu3 }
  0x9d   :  { %v647_v42 = vmul.f32 %v1508_v16, %v1508_v16  ;;  %v648_v43 = vmul.f32 %v1510_v17, %v1510_v17 }
  0x9e   :  { %v1456_v50 = vpop.f32.mrf.mxu0  ;;  %v1485_v63 = vpop.f32.mrf.mxu1 }
  0x9f   :  { %v246_v10 = vmul.f32 %v1456_v50, %v1456_v50  ;;  %v247_v11 = vmul.f32 %v1485_v63, %v1485_v63  ;;  %v655_v45 = vadd.f32 %v648_v43, %v647_v42 }
  0xa1   :  { %v256_v12 = vadd.f32 %v247_v11, %v246_v10 }
  0xa4   :  { %v1512_v18 = vpop.f32.mrf.mxu2  ;;  %v1514_v19 = vpop.f32.mrf.mxu3 }
  0xa5   :  { %v649_v38 = vmul.f32 %v1512_v18, %v1512_v18  ;;  %v650_v39 = vmul.f32 %v1514_v19, %v1514_v19 }
  0xa6   :  { %v1458_v51 = vpop.f32.mrf.mxu0  ;;  %v1487_v0 = vpop.f32.mrf.mxu1 }
  0xa7   :  { %v248_v2 = vmul.f32 %v1458_v51, %v1458_v51  ;;  %v249_v3 = vmul.f32 %v1487_v0, %v1487_v0  ;;  %v658_v41 = vadd.f32 %v650_v39, %v649_v38 }
  0xa9   :  { %v259_v4 = vadd.f32 %v249_v3, %v248_v2 }
  0xac   :  { %v1516_v20 = vpop.f32.mrf.mxu2  ;;  %v1518_v21 = vpop.f32.mrf.mxu3 }
  0xad   :  { %v651_v36 = vmul.f32 %v1516_v20, %v1516_v20  ;;  %v652_v37 = vmul.f32 %v1518_v21, %v1518_v21 }
  0xaf   :  { %v661_v40 = vadd.f32 %v652_v37, %v651_v36 }
  0xb4   :  { %v1522_v27 = vpop.f32.mrf.mxu2  ;;  %v1524_v28 = vpop.f32.mrf.mxu3 }
  0xb5   :  { %v653_v31 = vmul.f32 %v1522_v27, %v1522_v27  ;;  %v654_v32 = vmul.f32 %v1524_v28, %v1524_v28 }
  0xb7   :  { %v664_v34 = vadd.f32 %v654_v32, %v653_v31 }
  0xf9   :  { %v1460_v52 = vpop.f32.mrf.mxu0 }
  0xfa   :  { %v318_v53 = vmul.f32 %v1460_v52, %v1460_v52 }
  0xfc   :  { %727 = vrot.lane.b32.xlu0 %v318_v53, %s1369_s19  ;;  %v322_v54 = vsel %vm43_vm2, %v318_v53, 0.0 }
  0xfd   :  { %323 = vadd.xlane.f32.xlu2 %v322_v54 }
 0x101   :  { %v1466_v55 = vpop.f32.mrf.mxu0 }
 0x102   :  { %v319_v56 = vmul.f32 %v1466_v55, %v1466_v55 }
 0x104   :  { %729 = vrot.lane.b32.xlu1 %v319_v56, %s1369_s19  ;;  %v325_v1 = vsel %vm43_vm2, %v319_v56, 0.0 }
 0x109   :  { %v1473_v58 = vpop.f32.mrf.mxu0 }
 0x10a   :  { %v320_v59 = vmul.f32 %v1473_v58, %v1473_v58 }
 0x10c   :  { %731 = vrot.lane.b32.xlu1 %v320_v59, %s1369_s19  ;;  %v328_v5 = vsel %vm43_vm2, %v320_v59, 0.0 }
 0x111   :  { %v1480_v61 = vpop.f32.mrf.mxu0 }
 0x112   :  { %v321_v62 = vmul.f32 %v1480_v61, %v1480_v61 }
 0x114   :  { %v331_v9 = vsel %vm43_vm2, %v321_v62, 0.0 }
 0x115   :  { %733 = vrot.lane.b32.xlu2 %v321_v62, %s1369_s19 }
 0x126   :  { %326 = vadd.xlane.f32.xlu0 %v325_v1 }
 0x12e   :  { %260 = vadd.xlane.f32.xlu0 %v259_v4 }
 0x136   :  { %329 = vadd.xlane.f32.xlu1 %v328_v5 }
 0x13e   :  { %251 = vadd.xlane.f32.xlu1 %v250_v8  ;;  %332 = vadd.xlane.f32.xlu2 %v331_v9 }
 0x146   :  { %257 = vadd.xlane.f32.xlu2 %v256_v12 }
 0x14e   :  { %254 = vadd.xlane.f32.xlu2 %v253_v15 }
 0x16e   :  { %v728_v22 = vpop.permute.xlu0 %727 }
 0x16f   :  { %v739_v23 = vsel %vm43_vm2, %v728_v22, 0.0 }
 0x170   :  { %v324_v24 = vpop.xlane.xlu2 %323  ;;  %740 = vadd.xlane.f32.xlu0 %v739_v23 }
 0x171   :  { %v334_v44 = vmax.f32 %v324_v24, 1e-24 }
 0x173   :  { %1239 = vrsqrt.f32 %v334_v44  ;;  %vm344_vm4 = vweird.f32 %v334_v44 }
 0x176   :  { %v730_v25 = vpop.permute.xlu1 %729 }
 0x177   :  { %v742_v26 = vsel %vm43_vm2, %v730_v25, 0.0 }
 0x178   :  { %743 = vadd.xlane.f32.xlu1 %v742_v26  ;;  %v734_v29 = vpop.permute.xlu2 %733 }
 0x179   :  { %v748_v30 = vsel %vm43_vm2, %v734_v29, 0.0  ;;  %v1240_v46 = vpop.eup %1239 }
 0x17a   :  { %749 = vadd.xlane.f32.xlu0 %v748_v30  ;;  %v339_v47 = vmul.f32 %v1240_v46, %v334_v44  ;;  %vm345_vm3 = vweird.f32 %v1240_v46 }
 0x17b   :  { %vm346_vm6 = vmor %vm344_vm4, %vm345_vm3 }
 0x17c   :  { %v340_v56 = vmul.f32 %v1240_v46, %v339_v47 }
 0x17e   :  { %v732_v33 = vpop.permute.xlu1 %731  ;;  %v341_v59 = vmul.f32 0.5, %v340_v56 }
 0x17f   :  { %v745_v35 = vsel %vm43_vm2, %v732_v33, 0.0 }
 0x180   :  { %746 = vadd.xlane.f32.xlu2 %v745_v35  ;;  %v342_v1 = vsub.f32 1.5, %v341_v59 }
 0x182   :  { %665 = vadd.xlane.f32.xlu0 %v664_v34  ;;  %v343_v7 = vmul.f32 %v1240_v46, %v342_v1 }
 0x184   :  { %v347_v11 = vsel %vm346_vm6, %v1240_v46, %v343_v7 }
 0x185   :  { %v378_v14 = vmul.f32 %v347_v11, %v1460_v52 }
 0x188   :  { %662 = vadd.xlane.f32.xlu2 %v661_v40 }
 0x18a   :  { %659 = vadd.xlane.f32.xlu0 %v658_v41 }
 0x190   :  { %656 = vadd.xlane.f32.xlu2 %v655_v45 }
 0x199   :  { %v327_v53 = vpop.xlane.xlu0 %326 }
 0x19a   :  { %v335_v54 = vmax.f32 %v327_v53, 1e-24 }
 0x19c   :  { %1241 = vrsqrt.f32 %v335_v54  ;;  %vm354_vm7 = vweird.f32 %v335_v54 }
 0x1a1   :  { %v261_v3 = vpop.xlane.xlu0 %260 }
 0x1a2   :  { %v1242_v62 = vpop.eup %1241  ;;  %v1544_v5 = vmax.f32 %v261_v3, 1e-24 }
 0x1a3   :  { %v349_v2 = vmul.f32 %v1242_v62, %v335_v54  ;;  %vm355_vm5 = vweird.f32 %v1242_v62 }
 0x1a4   :  { %1243 = vrsqrt.f32 %v1544_v5  ;;  %vm356_vm8 = vmor %vm354_vm7, %vm355_vm5  ;;  %vm302_vm0 = vweird.f32 %v1544_v5 }
 0x1a5   :  { %v350_v4 = vmul.f32 %v1242_v62, %v349_v2 }
 0x1a7   :  { %v351_v6 = vmul.f32 0.5, %v350_v4 }
 0x1a9   :  { %v352_v8 = vsub.f32 1.5, %v351_v6  ;;  %v330_v9 = vpop.xlane.xlu1 %329 }
 0x1aa   :  { %v336_v10 = vmax.f32 %v330_v9, 1e-24  ;;  %v1549_v22 = vpop.eup %1243 }
 0x1ab   :  { %v353_v12 = vmul.f32 %v1242_v62, %v352_v8  ;;  %v297_v31 = vmul.f32 %v1549_v22, %v1544_v5  ;;  %vm303_vm12 = vweird.f32 %v1549_v22 }
 0x1ac   :  { %1245 = vrsqrt.f32 %v336_v10  ;;  %vm364_vm10 = vweird.f32 %v336_v10  ;;  %vm1565_vm3 = vmor %vm302_vm0, %vm303_vm12 }
 0x1ad   :  { %v357_v13 = vsel %vm356_vm8, %v1242_v62, %v353_v12  ;;  %v298_v34 = vmul.f32 %v1549_v22, %v297_v31 }
 0x1ae   :  { %v379_v15 = vmul.f32 %v357_v13, %v1466_v55 }
 0x1af   :  { %v299_v40 = vmul.f32 0.5, %v298_v34 }
 0x1b0   :  { %v386_v23 = vpack.c.bf16 %v379_v15, %v378_v14 }
 0x1b1   :  { %v252_v24 = vpop.xlane.xlu1 %251  ;;  %v333_v25 = vpop.xlane.xlu2 %332  ;;  %v300_v45 = vsub.f32 1.5, %v299_v40 }
 0x1b2   :  { %v1246_v26 = vpop.eup %1245  ;;  %v1551_v29 = vmax.f32 %v252_v24, 1e-24  ;;  %v337_v30 = vmax.f32 %v333_v25, 1e-24  ;;  %390 = vxpose.xlu1.c.b16.start [1/2] (short) (narrow) %v386_v23, 64 }
 0x1b3   :  { %v359_v32 = vmul.f32 %v1246_v26, %v336_v10  ;;  %vm365_vm9 = vweird.f32 %v1246_v26  ;;  %v301_v1 = vmul.f32 %v1549_v22, %v300_v45 }
 0x1b4   :  { %1247 = vrsqrt.f32 %v1551_v29  ;;  %vm366_vm13 = vmor %vm364_vm10, %vm365_vm9  ;;  %vm374_vm14 = vweird.f32 %v337_v30  ;;  %vm272_vm8 = vweird.f32 %v1551_v29 }
 0x1b5   :  { %v360_v33 = vmul.f32 %v1246_v26, %v359_v32  ;;  %1249 = vrsqrt.f32 %v337_v30  ;;  %v305_v13 = vsel %vm1565_vm3, %v1549_v22, %v301_v1 }
 0x1b7   :  { %v361_v35 = vmul.f32 0.5, %v360_v33 }
 0x1b9   :  { %v258_v36 = vpop.xlane.xlu2 %257  ;;  %v362_v41 = vsub.f32 1.5, %v361_v35 }
 0x1ba   :  { %v1557_v37 = vpop.eup %1247  ;;  %v264_v38 = vmax.f32 %v258_v36, 1e-24 }
 0x1bb   :  { %v1250_v39 = vpop.eup %1249  ;;  %v267_v43 = vmul.f32 %v1557_v37, %v1551_v29  ;;  %v363_v46 = vmul.f32 %v1246_v26, %v362_v41  ;;  %vm273_vm7 = vweird.f32 %v1557_v37 }
 0x1bc   :  { %v369_v42 = vmul.f32 %v1250_v39, %v337_v30  ;;  %1251 = vrsqrt.f32 %v264_v38  ;;  %vm375_vm11 = vweird.f32 %v1250_v39  ;;  %vm292_vm5 = vweird.f32 %v264_v38  ;;  %vm274_vm9 = vmor %vm272_vm8, %vm273_vm7 }
 0x1bd   :  { %v268_v53 = vmul.f32 %v1557_v37, %v267_v43  ;;  %v367_v4 = vsel %vm366_vm13, %v1246_v26, %v363_v46  ;;  %vm376_vm15 = vmor %vm374_vm14, %vm375_vm11  ;;  %v309_v26 = vmul.f32 10.0, %v305_v13 }
 0x1be   :  { %v370_v44 = vmul.f32 %v1250_v39, %v369_v42  ;;  %v380_v11 = vmul.f32 %v367_v4, %v1473_v58 }
 0x1bf   :  { %v269_v6 = vmul.f32 0.5, %v268_v53  ;;  %v316_v35 = vmul.f32 %v309_v26, %v1458_v51 }
 0x1c0   :  { %v371_v47 = vmul.f32 0.5, %v370_v44 }
 0x1c1   :  { %v255_v54 = vpop.xlane.xlu2 %254  ;;  %v270_v14 = vsub.f32 1.5, %v269_v6 }
 0x1c2   :  { %v1252_v56 = vpop.eup %1251  ;;  %v372_v59 = vsub.f32 1.5, %v371_v47  ;;  %v263_v62 = vmax.f32 %v255_v54, 1e-24 }
 0x1c3   :  { %v287_v2 = vmul.f32 %v1252_v56, %v264_v38  ;;  %vm293_vm4 = vweird.f32 %v1252_v56  ;;  %v271_v30 = vmul.f32 %v1557_v37, %v270_v14  ;;  %v317_v38 = vmul.f32 %v309_v26, %v1487_v0 }
 0x1c4   :  { %v373_v3 = vmul.f32 %v1250_v39, %v372_v59  ;;  %1253 = vrsqrt.f32 %v263_v62  ;;  %vm294_vm6 = vmor %vm292_vm5, %vm293_vm4  ;;  %vm282_vm11 = vweird.f32 %v263_v62 }
 0x1c5   :  { %v288_v7 = vmul.f32 %v1252_v56, %v287_v2  ;;  %v275_v40 = vsel %vm274_vm9, %v1557_v37, %v271_v30 }
 0x1c6   :  { %v377_v8 = vsel %vm376_vm15, %v1250_v39, %v373_v3  ;;  %v306_v29 = vmul.f32 10.0, %v275_v40 }
 0x1c7   :  { %v289_v10 = vmul.f32 0.5, %v288_v7  ;;  %v381_v12 = vmul.f32 %v377_v8, %v1480_v61 }
 0x1c8   :  { %v310_v51 = vmul.f32 %v306_v29, %v1452_v48  ;;  %v311_v0 = vmul.f32 %v306_v29, %v1471_v57 }
 0x1c9   :  { %v290_v15 = vsub.f32 1.5, %v289_v10  ;;  %v387_v23 = vpack.c.bf16 %v381_v12, %v380_v11 }
 0x1ca   :  { %v1254_v24 = vpop.eup %1253 }
 0x1cb   :  { %v291_v5 = vmul.f32 %v1252_v56, %v290_v15  ;;  %v277_v25 = vmul.f32 %v1254_v24, %v263_v62  ;;  %391 = vxpose.xlu1.c.b16.end [2/2] (short) (narrow) %v387_v23, 64  ;;  %vm283_vm10 = vweird.f32 %v1254_v24 }
 0x1cc   :  { %vm284_vm12 = vmor %vm282_vm11, %vm283_vm10 }
 0x1cd   :  { %v278_v31 = vmul.f32 %v1254_v24, %v277_v25  ;;  %v295_v32 = vsel %vm294_vm6, %v1252_v56, %v291_v5 }
 0x1ce   :  { %v308_v33 = vmul.f32 10.0, %v295_v32 }
 0x1cf   :  { %v279_v22 = vmul.f32 0.5, %v278_v31 }
 0x1d0   :  { %v314_v34 = vmul.f32 %v308_v33, %v1456_v50  ;;  %v315_v36 = vmul.f32 %v308_v33, %v1485_v63 }
 0x1d1   :  { %v280_v39 = vsub.f32 1.5, %v279_v22 }
 0x1d2   :  { %v384_v41 = vpack.c.bf16 %v316_v35, %v314_v34  ;;  %v385_v42 = vpack.c.bf16 %v317_v38, %v315_v36 }
 0x1d3   :  { %v281_v43 = vmul.f32 %v1254_v24, %v280_v39 }
 0x1d4   :  { %425 = vmatpush.bf16.msrb.mxu1 %v384_v41  ;;  %454 = vmatpush.bf16.msrb.mxu2 %v385_v42 }
 0x1d5   :  { %v285_v44 = vsel %vm284_vm12, %v1254_v24, %v281_v43 }
 0x1d6   :  { %v307_v50 = vmul.f32 10.0, %v285_v44 }
 0x1d8   :  { %v312_v63 = vmul.f32 %v307_v50, %v1454_v49  ;;  %v313_v45 = vmul.f32 %v307_v50, %v1478_v60 }
 0x1da   :  { %v382_v46 = vpack.c.bf16 %v312_v63, %v310_v51  ;;  %v383_v37 = vpack.c.bf16 %v313_v45, %v311_v0 }
 0x1dc   :  { %426 = vmatpush.bf16.msrb.mxu1 %v382_v46  ;;  %455 = vmatpush.bf16.msrb.mxu2 %v383_v37 }
 0x1e3   :  { %v741_v47 = vpop.xlane.xlu0 %740 }
 0x1e4   :  { %v751_v53 = vmax.f32 %v741_v47, 1e-24 }
 0x1e6   :  { %1255 = vrsqrt.f32 %v751_v53  ;;  %vm761_vm14 = vweird.f32 %v751_v53 }
 0x1eb   :  { %v744_v54 = vpop.xlane.xlu1 %743 }
 0x1ec   :  { %v1256_v56 = vpop.eup %1255  ;;  %v752_v59 = vmax.f32 %v744_v54, 1e-24 }
 0x1ed   :  { %v756_v62 = vmul.f32 %v1256_v56, %v751_v53  ;;  %v750_v1 = vpop.xlane.xlu0 %749  ;;  %vm762_vm13 = vweird.f32 %v1256_v56 }
 0x1ee   :  { %1257 = vrsqrt.f32 %v752_v59  ;;  %v754_v48 = vmax.f32 %v750_v1, 1e-24  ;;  %vm1590_vm15 = vmor %vm761_vm14, %vm762_vm13  ;;  %vm771_vm3 = vweird.f32 %v752_v59 }
 0x1ef   :  { %v757_v2 = vmul.f32 %v1256_v56, %v756_v62 }
 0x1f0   :  { %1259 = vrsqrt.f32 %v754_v48  ;;  %vm791_vm6 = vweird.f32 %v754_v48 }
 0x1f1   :  { %v758_v49 = vmul.f32 0.5, %v757_v2 }
 0x1f3   :  { %v747_v57 = vpop.xlane.xlu2 %746  ;;  %v759_v4 = vsub.f32 1.5, %v758_v49 }
 0x1f4   :  { %v1258_v3 = vpop.eup %1257  ;;  %v753_v60 = vmax.f32 %v747_v57, 1e-24 }
 0x1f5   :  { %v766_v6 = vmul.f32 %v1258_v3, %v752_v59  ;;  %v666_v7 = vpop.xlane.xlu0 %665  ;;  %v760_v12 = vmul.f32 %v1256_v56, %v759_v4  ;;  %vm772_vm0 = vweird.f32 %v1258_v3 }
 0x1f6   :  { %v1586_v8 = vpop.eup %1259  ;;  %1261 = vrsqrt.f32 %v753_v60  ;;  %v670_v9 = vmax.f32 %v666_v7, 1e-24  ;;  %vm773_vm4 = vmor %vm771_vm3, %vm772_vm0  ;;  %vm781_vm11 = vweird.f32 %v753_v60 }
 0x1f7   :  { %v767_v10 = vmul.f32 %v1258_v3, %v766_v6  ;;  %v786_v11 = vmul.f32 %v1586_v8, %v754_v48  ;;  %v764_v22 = vsel %vm1590_vm15, %v1256_v56, %v760_v12  ;;  %vm792_vm5 = vweird.f32 %v1586_v8 }
 0x1f8   :  { %1263 = vrsqrt.f32 %v670_v9  ;;  %v795_v40 = vmul.f32 %v764_v22, %v1460_v52  ;;  %vm1600_vm7 = vmor %vm791_vm6, %vm792_vm5  ;;  %vm707_vm9 = vweird.f32 %v670_v9 }
 0x1f9   :  { %v768_v13 = vmul.f32 0.5, %v767_v10  ;;  %v787_v14 = vmul.f32 %v1586_v8, %v786_v11 }
 0x1fb   :  { %v769_v15 = vsub.f32 1.5, %v768_v13  ;;  %v788_v23 = vmul.f32 0.5, %v787_v14  ;;  %v663_v24 = vpop.xlane.xlu2 %662 }
 0x1fc   :  { %v1262_v5 = vpop.eup %1261  ;;  %v669_v26 = vmax.f32 %v663_v24, 1e-24 }
 0x1fd   :  { %v770_v30 = vmul.f32 %v1258_v3, %v769_v15  ;;  %v789_v31 = vsub.f32 1.5, %v788_v23  ;;  %v776_v32 = vmul.f32 %v1262_v5, %v753_v60  ;;  %v660_v33 = vpop.xlane.xlu0 %659  ;;  %vm782_vm8 = vweird.f32 %v1262_v5 }
 0x1fe   :  { %v1264_v34 = vpop.eup %1263  ;;  %1265 = vrsqrt.f32 %v669_v26  ;;  %v668_v35 = vmax.f32 %v660_v33, 1e-24  ;;  %vm783_vm12 = vmor %vm781_vm11, %vm782_vm8  ;;  %vm697_vm14 = vweird.f32 %v669_v26 }
 0x1ff   :  { %v777_v36 = vmul.f32 %v1262_v5, %v776_v32  ;;  %v702_v38 = vmul.f32 %v1264_v34, %v670_v9  ;;  %v774_v39 = vsel %vm773_vm4, %v1258_v3, %v770_v30  ;;  %v790_v41 = vmul.f32 %v1586_v8, %v789_v31 }
 0x200   :  { %1267 = vrsqrt.f32 %v668_v35  ;;  %v796_v29 = vmul.f32 %v774_v39, %v1466_v55  ;;  %vm708_vm10 = vweird.f32 %v1264_v34  ;;  %vm687_vm3 = vweird.f32 %v668_v35 }
 0x201   :  { %v778_v42 = vmul.f32 0.5, %v777_v36  ;;  %v703_v43 = vmul.f32 %v1264_v34, %v702_v38  ;;  %v794_v55 = vsel %vm1600_vm7, %v1586_v8, %v790_v41  ;;  %vm1609_vm13 = vmor %vm707_vm9, %vm708_vm10  ;;  %vm406_vm9 = vcmask 261120  }
 0x202   :  { %v803_v63 = vpack.c.bf16 %v796_v29, %v795_v40  ;;  %v798_v48 = vmul.f32 %v794_v55, %v1480_v61 }
 0x203   :  { %v779_v44 = vsub.f32 1.5, %v778_v42  ;;  %v704_v50 = vmul.f32 0.5, %v703_v43  ;;  %v657_v51 = vpop.xlane.xlu2 %656 }
 0x204   :  { %v1266_v0 = vpop.eup %1265  ;;  %v667_v52 = vmax.f32 %v657_v51, 1e-24  ;;  %807 = vrot.lane.b32.xlu2 %v803_v63, %s1369_s19  ;;  %v57_v51 = vld [vmem:[%s1820_s2 + $0x58] sm:$0xff] }
 0x205   :  { %v780_v46 = vmul.f32 %v1262_v5, %v779_v44  ;;  %v705_v37 = vsub.f32 1.5, %v704_v50  ;;  %v692_v47 = vmul.f32 %v1266_v0, %v669_v26  ;;  %vm698_vm15 = vweird.f32 %v1266_v0  ;;  %v56_v50 = vld [vmem:[%s1820_s2 + $0x50] sm:$0xff] }
 0x206   :  { %v1268_v53 = vpop.eup %1267  ;;  %1269 = vrsqrt.f32 %v667_v52  ;;  %vm699_vm0 = vmor %vm697_vm14, %vm698_vm15  ;;  %vm677_vm6 = vweird.f32 %v667_v52  ;;  %v68_v63 = vpack.c.bf16 %v56_v50, %v56_v50 }
 0x207   :  { %v706_v54 = vmul.f32 %v1264_v34, %v705_v37  ;;  %v693_v56 = vmul.f32 %v1266_v0, %v692_v47  ;;  %v682_v59 = vmul.f32 %v1268_v53, %v668_v35  ;;  %v784_v1 = vsel %vm783_vm12, %v1262_v5, %v780_v46 }
 0x208   :  { %v797_v57 = vmul.f32 %v784_v1, %v1473_v58  ;;  %vm688_vm4 = vweird.f32 %v1268_v53 }
 0x209   :  { %v694_v2 = vmul.f32 0.5, %v693_v56  ;;  %v683_v49 = vmul.f32 %v1268_v53, %v682_v59  ;;  %v710_v3 = vsel %vm1609_vm13, %v1264_v34, %v706_v54  ;;  %vm1618_vm5 = vmor %vm687_vm3, %vm688_vm4 }
 0x20a   :  { %v804_v6 = vpack.c.bf16 %v798_v48, %v797_v57  ;;  %v714_v61 = vmul.f32 10.0, %v710_v3 }
 0x20b   :  { %v695_v60 = vsub.f32 1.5, %v694_v2  ;;  %v684_v4 = vmul.f32 0.5, %v683_v49 }
 0x20c   :  { %v1270_v7 = vpop.eup %1269  ;;  %809 = vrot.lane.b32.xlu0 %v804_v6, %s1369_s19  ;;  %v721_v24 = vmul.f32 %v714_v61, %v1522_v27  ;;  %v722_v25 = vmul.f32 %v714_v61, %v1524_v28 }
 0x20d   :  { %v696_v8 = vmul.f32 %v1266_v0, %v695_v60  ;;  %v685_v9 = vsub.f32 1.5, %v684_v4  ;;  %v672_v10 = vmul.f32 %v1270_v7, %v667_v52  ;;  %vm678_vm7 = vweird.f32 %v1270_v7 }
 0x20e   :  { %vm679_vm8 = vmor %vm677_vm6, %vm678_vm7  ;;  %v190_v52 = vunpack.c.l.b16 %v68_v63 }
 0x20f   :  { %v700_v11 = vsel %vm699_vm0, %v1266_v0, %v696_v8  ;;  %v686_v12 = vmul.f32 %v1268_v53, %v685_v9  ;;  %v673_v13 = vmul.f32 %v1270_v7, %v672_v10  ;;  %v69_v0 = vpack.c.bf16 %v57_v51, %v57_v51 }
 0x210   :  { %v713_v58 = vmul.f32 10.0, %v700_v11 }
 0x211   :  { %v674_v15 = vmul.f32 0.5, %v673_v13  ;;  %v690_v30 = vsel %vm1618_vm5, %v1268_v53, %v686_v12  ;;  %v191_v46 = vunpack.c.l.b16 %v69_v0 }
 0x212   :  { %v719_v23 = vmul.f32 %v713_v58, %v1516_v20  ;;  %v720_v5 = vmul.f32 %v713_v58, %v1518_v21  ;;  %v712_v22 = vmul.f32 10.0, %v690_v30 }
 0x213   :  { %v675_v26 = vsub.f32 1.5, %v674_v15  ;;  %v195_v37 = vpack.c.b16 %v191_v46, %v190_v52 }
 0x214   :  { %v801_v31 = vpack.c.bf16 %v721_v24, %v719_v23  ;;  %v802_v32 = vpack.c.bf16 %v722_v25, %v720_v5  ;;  %v717_v27 = vmul.f32 %v712_v22, %v1512_v18  ;;  %v718_v28 = vmul.f32 %v712_v22, %v1514_v19 }
 0x215   :  { %v676_v33 = vmul.f32 %v1270_v7, %v675_v26 }
 0x216   :  { %847 = vmatpush.bf16.msra.mxu0 %v801_v31  ;;  %876 = vmatpush.bf16.msra.mxu1 %v802_v32 }
 0x217   :  { %v680_v34 = vsel %vm679_vm8, %v1270_v7, %v676_v33 }
 0x218   :  { %v711_v35 = vmul.f32 10.0, %v680_v34 }
 0x21a   :  { %v715_v20 = vmul.f32 %v711_v35, %v1508_v16  ;;  %v716_v21 = vmul.f32 %v711_v35, %v1510_v17  ;;  %v54_v16 = vld [vmem:[%s1820_s2 + $0x40] sm:$0xff]  ;;  %v55_v17 = vld [vmem:[%s1820_s2 + $0x48] sm:$0xff] }
 0x21b   :  { %v66_v18 = vpack.c.bf16 %v54_v16, %v54_v16  ;;  %v67_v19 = vpack.c.bf16 %v55_v17, %v55_v17 }
 0x21c   :  { %v799_v36 = vpack.c.bf16 %v717_v27, %v715_v20  ;;  %v800_v38 = vpack.c.bf16 %v718_v28, %v716_v21 }
 0x21d   :  { %v188_v42 = vunpack.c.l.b16 %v66_v18  ;;  %v189_v43 = vunpack.c.l.b16 %v67_v19 }
 0x21e   :  { %848 = vmatpush.bf16.msra.mxu0 %v799_v36  ;;  %877 = vmatpush.bf16.msra.mxu1 %v800_v38 }
 0x21f   :  { %v194_v29 = vpack.c.b16 %v189_v43, %v188_v42 }
 0x221   :  { %1201 = vmatmul.msk.bf16.gmra.mxu0 %vm80_vm1, %v194_v29 }
 0x231   :  { %1202 = vmatmul.msk.bf16.gmra.mxu0 %vm80_vm1, %v195_v37  ;;  %vm1162_vm1 = vcmask 1043456  }
 0x25e   :  { %v808_v39 = vpop.permute.xlu2 %807 }
 0x25f   :  { %813 = vxpose.xlu0.c.b16.start [1/2] (short) (narrow) %v808_v39, 64 }
 0x267   :  { %v398_v40 = vpop.trf.xlu1 }
 0x268   :  { %1203 = vmatmul.msk.bf16.vlgmr.msrb.gmra.mxu1 %vm406_vm9, %v398_v40  ;;  %1207 = vmatmul.msk.bf16.vlgmr.msrb.gmra.mxu2 %vm406_vm9, %v398_v40 }
 0x277   :  { %v399_v41 = vpop.trf.xlu1 }
 0x278   :  { %1204 = vmatmul.msk.bf16.gmra.mxu1 %vm406_vm9, %v399_v41  ;;  %1208 = vmatmul.msk.bf16.gmra.mxu2 %vm406_vm9, %v399_v41 }
 0x27e   :  { %v810_v44 = vpop.permute.xlu0 %809 }
 0x27f   :  { %814 = vxpose.xlu0.c.b16.end [2/2] (short) (narrow) %v810_v44, 64 }
 0x287   :  { %v400_v45 = vpop.trf.xlu1 }
 0x288   :  { %1205 = vmatmul.msk.bf16.gmra.mxu1 %vm406_vm9, %v400_v45  ;;  %1209 = vmatmul.msk.bf16.gmra.mxu2 %vm406_vm9, %v400_v45 }
 0x297   :  { %v401_v47 = vpop.trf.xlu1 }
 0x298   :  { %1206 = vmatmul.msk.bf16.gmra.mxu1 %vm406_vm9, %v401_v47  ;;  %1210 = vmatmul.msk.bf16.gmra.mxu2 %vm406_vm9, %v401_v47 }
 0x29e   :  { %v230_v31 = vpop.f32.mrf.mxu0 }
 0x2a6   :  { %v232_v41 = vpop.f32.mrf.mxu0 }
 0x2a7   :  { %v1697_v17 = vpack.c.bf16 %v232_v41, %v230_v31 }
 0x2a9   :  { %1009 = vrot.lane.b32.xlu2 %v1697_v17, %s1369_s19 }
 0x2e5   :  { %v1654_v55 = vpop.f32.mrf.mxu1 }
 0x2eb   :  { %v1656_v53 = vpop.f32.mrf.mxu2 }
 0x2ed   :  { %v1658_v54 = vpop.f32.mrf.mxu1 }
 0x2f3   :  { %v1660_v56 = vpop.f32.mrf.mxu2 }
 0x2f5   :  { %v1662_v59 = vpop.f32.mrf.mxu1 }
 0x2f6   :  { %v477_v60 = vmax.f32 %v1654_v55, %v1662_v59 }
 0x2fb   :  { %v1664_v62 = vpop.f32.mrf.mxu2 }
 0x2fc   :  { %v490_v9 = vmax.f32 %v1656_v53, %v1664_v62 }
 0x2fd   :  { %v1666_v1 = vpop.f32.mrf.mxu1 }
 0x2fe   :  { %v478_v6 = vmax.f32 %v1658_v54, %v1666_v1 }
 0x303   :  { %v1668_v48 = vpop.f32.mrf.mxu2 }
 0x304   :  { %v491_v12 = vmax.f32 %v1660_v56, %v1668_v48 }
 0x305   :  { %v438_v2 = vpop.f32.mrf.mxu1 }
 0x306   :  { %v479_v7 = vmax.f32 %v477_v60, %v438_v2 }
 0x30b   :  { %v1670_v49 = vpop.f32.mrf.mxu2 }
 0x30c   :  { %v492_v14 = vmax.f32 %v490_v9, %v1670_v49 }
 0x30d   :  { %v440_v57 = vpop.f32.mrf.mxu1 }
 0x30e   :  { %v480_v8 = vmax.f32 %v478_v6, %v440_v57 }
 0x313   :  { %v1672_v3 = vpop.f32.mrf.mxu2 }
 0x314   :  { %v493_v23 = vmax.f32 %v491_v12, %v1672_v3 }
 0x315   :  { %v443_v4 = vpop.f32.mrf.mxu1 }
 0x316   :  { %v481_v61 = vmax.f32 %v479_v7, %v443_v4 }
 0x31b   :  { %v1680_v10 = vpop.f32.mrf.mxu2  ;;  %v821_v11 = vpop.trf.xlu0 }
 0x31c   :  { %1215 = vmatmul.msk.bf16.vlgmr.msra.gmra.mxu0 %vm406_vm9, %v821_v11  ;;  %1219 = vmatmul.msk.bf16.vlgmr.msra.gmra.mxu1 %vm406_vm9, %v821_v11  ;;  %v494_v5 = vmax.f32 %v492_v14, %v1680_v10 }
 0x31d   :  { %v445_v13 = vpop.f32.mrf.mxu1 }
 0x31e   :  { %v482_v58 = vmax.f32 %v480_v8, %v445_v13 }
 0x320   :  { %v483_v15 = vmax.f32 %v481_v61, %v482_v58 }
 0x322   :  { %v484_v24 = vrot.slane %v483_v15, 4 }
 0x323   :  { %v474_v25 = vpop.f32.mrf.mxu2 }
 0x324   :  { %v485_v26 = vmax.f32 %v483_v15, %v484_v24  ;;  %v495_v30 = vmax.f32 %v493_v23, %v474_v25 }
 0x326   :  { %v486_v32 = vrot.slane %v485_v26, 2  ;;  %v496_v33 = vmax.f32 %v494_v5, %v495_v30 }
 0x328   :  { %v487_v22 = vmax.f32 %v485_v26, %v486_v32  ;;  %v497_v34 = vrot.slane %v496_v33, 4 }
 0x32a   :  { %v488_v35 = vrot.slane %v487_v22, 1  ;;  %v498_v20 = vmax.f32 %v496_v33, %v497_v34 }
 0x32b   :  { %v822_v21 = vpop.trf.xlu0 }
 0x32c   :  { %v1689_v27 = vmax.f32 %v487_v22, %v488_v35  ;;  %v499_v28 = vrot.slane %v498_v20, 2  ;;  %1216 = vmatmul.msk.bf16.gmra.mxu0 %vm406_vm9, %v822_v21  ;;  %1220 = vmatmul.msk.bf16.gmra.mxu1 %vm406_vm9, %v822_v21 }
 0x32e   :  { %v517_v36 = vsub.f32 %v445_v13, %v1689_v27  ;;  %v515_v38 = vsub.f32 %v443_v4, %v1689_v27  ;;  %v500_v39 = vmax.f32 %v498_v20, %v499_v28  ;;  %v511_v40 = vsub.f32 %v438_v2, %v1689_v27 }
 0x32f   :  { %v513_v16 = vsub.f32 %v440_v57, %v1689_v27  ;;  %v235_v57 = vpop.f32.mrf.mxu0  ;;  %v503_v8 = vsub.f32 %v1654_v55, %v1689_v27 }
 0x330   :  { %v547_v18 = vmul.f32 1.442695, %v517_v36  ;;  %v543_v19 = vmul.f32 1.442695, %v515_v38  ;;  %v501_v42 = vrot.slane %v500_v39, 1 }
 0x331   :  { %v535_v29 = vmul.f32 1.442695, %v511_v40  ;;  %v539_v44 = vmul.f32 1.442695, %v513_v16  ;;  %v519_v58 = vmul.f32 1.442695, %v503_v8 }
 0x332   :  { %1271 = vpow2.f32 %v547_v18  ;;  %v502_v43 = vmax.f32 %v500_v39, %v501_v42 }
 0x333   :  { %1273 = vpow2.f32 %v543_v19 }
 0x334   :  { %v504_v50 = vsub.f32 %v1656_v53, %v502_v43  ;;  %v506_v51 = vsub.f32 %v1660_v56, %v502_v43  ;;  %v508_v63 = vsub.f32 %v1664_v62, %v502_v43  ;;  %v510_v0 = vsub.f32 %v1668_v48, %v502_v43 }
 0x335   :  { %v512_v45 = vsub.f32 %v1670_v49, %v502_v43  ;;  %v514_v52 = vsub.f32 %v1672_v3, %v502_v43  ;;  %v516_v46 = vsub.f32 %v1680_v10, %v502_v43  ;;  %1275 = vpow2.f32 %v535_v29 }
 0x336   :  { %v521_v37 = vmul.f32 1.442695, %v504_v50  ;;  %v525_v47 = vmul.f32 1.442695, %v506_v51  ;;  %v529_v2 = vmul.f32 1.442695, %v508_v63  ;;  %v518_v60 = vsub.f32 %v474_v25, %v502_v43 }
 0x337   :  { %v533_v4 = vmul.f32 1.442695, %v510_v0  ;;  %1277 = vpow2.f32 %v539_v44  ;;  %v537_v56 = vmul.f32 1.442695, %v512_v45  ;;  %v507_v62 = vsub.f32 %v1662_v59, %v1689_v27  ;;  %v237_v14 = vpop.f32.mrf.mxu0 }
 0x338   :  { %v1708_v53 = vpop.eup %1271  ;;  %1279 = vpow2.f32 %v521_v37  ;;  %v541_v49 = vmul.f32 1.442695, %v514_v52  ;;  %v509_v3 = vsub.f32 %v1666_v1, %v1689_v27  ;;  %v545_v7 = vmul.f32 1.442695, %v516_v46 }
 0x339   :  { %v1712_v48 = vpop.eup %1273  ;;  %1281 = vpow2.f32 %v525_v47  ;;  %v549_v9 = vmul.f32 1.442695, %v518_v60  ;;  %v505_v59 = vsub.f32 %v1658_v54, %v1689_v27  ;;  %v527_v11 = vmul.f32 1.442695, %v507_v62 }
 0x33a   :  { %v583_v6 = vpack.c.bf16 %v1708_v53, %v1712_v48  ;;  %1283 = vpow2.f32 %v529_v2  ;;  %v531_v1 = vmul.f32 1.442695, %v509_v3  ;;  %v389_v23 = vpack.c.bf16 %v237_v14, %v235_v57 }
 0x33b   :  { %1285 = vpow2.f32 %v533_v4  ;;  %v1276_v10 = vpop.eup %1275  ;;  %v823_v61 = vpop.trf.xlu0  ;;  %v523_v54 = vmul.f32 1.442695, %v505_v59 }
 0x33c   :  { %595 = vmatpush.bf16.msrb.mxu3 %v583_v6  ;;  %1287 = vpow2.f32 %v537_v56  ;;  %1217 = vmatmul.msk.bf16.gmra.mxu0 %vm406_vm9, %v823_v61 }
 0x33d   :  { %v1278_v12 = vpop.eup %1277  ;;  %1289 = vpow2.f32 %v541_v49  ;;  %1221 = vmatmul.msk.bf16.gmra.mxu1 %vm406_vm9, %v823_v61  ;;  %1011 = vrot.lane.b32.xlu2 %v389_v23, %s1369_s19 }
 0x33e   :  { %v1280_v13 = vpop.eup %1279  ;;  %1291 = vpow2.f32 %v545_v7  ;;  %v581_v55 = vpack.c.bf16 %v1278_v12, %v1276_v10 }
 0x33f   :  { %v1282_v15 = vpop.eup %1281  ;;  %1293 = vpow2.f32 %v549_v9 }
 0x340   :  { %v1284_v24 = vpop.eup %1283  ;;  %v564_v5 = vadd.f32 %v1282_v15, %v1280_v13  ;;  %596 = vmatpush.bf16.msrb.mxu3 %v581_v55  ;;  %1295 = vpow2.f32 %v527_v11  ;;  %v578_v0 = vpack.c.bf16 %v1282_v15, %v1280_v13 }
 0x341   :  { %v1286_v25 = vpop.eup %1285  ;;  %1297 = vpow2.f32 %v531_v1 }
 0x342   :  { %v1288_v26 = vpop.eup %1287  ;;  %v565_v30 = vadd.f32 %v1284_v24, %v564_v5  ;;  %1299 = vpow2.f32 %v519_v58  ;;  %v580_v50 = vpack.c.bf16 %v1286_v25, %v1284_v24 }
 0x343   :  { %v1290_v31 = vpop.eup %1289  ;;  %1301 = vpow2.f32 %v523_v54 }
 0x344   :  { %v1292_v32 = vpop.eup %1291  ;;  %v566_v33 = vadd.f32 %v1286_v25, %v565_v30  ;;  %v582_v43 = vpack.c.bf16 %v1290_v31, %v1288_v26 }
 0x345   :  { %v1294_v22 = vpop.eup %1293 }
 0x346   :  { %v1296_v34 = vpop.eup %1295  ;;  %v567_v35 = vadd.f32 %v1288_v26, %v566_v33  ;;  %v584_v41 = vpack.c.bf16 %v1294_v22, %v1292_v32 }
 0x347   :  { %v1298_v20 = vpop.eup %1297 }
 0x348   :  { %v1300_v27 = vpop.eup %1299  ;;  %v568_v21 = vadd.f32 %v1290_v31, %v567_v35  ;;  %v579_v28 = vpack.c.bf16 %v1298_v20, %v1296_v34 }
 0x349   :  { %v1302_v36 = vpop.eup %1301 }
 0x34a   :  { %v569_v38 = vadd.f32 %v1292_v32, %v568_v21  ;;  %597 = vmatpush.bf16.msrb.mxu3 %v579_v28  ;;  %v551_v39 = vadd.f32 %v1302_v36, %v1300_v27  ;;  %v577_v40 = vpack.c.bf16 %v1302_v36, %v1300_v27 }
 0x34b   :  { %v824_v19 = vpop.trf.xlu0 }
 0x34c   :  { %v1725_v16 = vadd.f32 %v1294_v22, %v569_v38  ;;  %v552_v18 = vadd.f32 %v1296_v34, %v551_v39  ;;  %1218 = vmatmul.msk.bf16.gmra.mxu0 %vm406_vm9, %v824_v19 }
 0x34d   :  { %1222 = vmatmul.msk.bf16.gmra.mxu1 %vm406_vm9, %v824_v19 }
 0x34e   :  { %v553_v42 = vadd.f32 %v1298_v20, %v552_v18  ;;  %598 = vmatpush.bf16.msrb.mxu3 %v577_v40 }
 0x350   :  { %v554_v29 = vadd.f32 %v1276_v10, %v553_v42 }
 0x351   :  { %1211 = vmatmul.msk.bf16.vlgmr.msrb.gmra.mxu3 %vm43_vm2, %v1697_v17 }
 0x352   :  { %614 = vmatpush.bf16.msra.mxu3 %v584_v41  ;;  %v555_v44 = vadd.f32 %v1278_v12, %v554_v29 }
 0x354   :  { %v556_v51 = vadd.f32 %v1712_v48, %v555_v44 }
 0x356   :  { %615 = vmatpush.bf16.msra.mxu3 %v582_v43  ;;  %v557_v63 = vadd.f32 %v1708_v53, %v556_v51 }
 0x358   :  { %v558_v33 = vrot.slane %v557_v63, 4 }
 0x35a   :  { %616 = vmatpush.bf16.msra.mxu3 %v580_v50  ;;  %v559_v20 = vadd.f32 %v558_v33, %v557_v63 }
 0x35c   :  { %v560_v50 = vrot.slane %v559_v20, 2 }
 0x35e   :  { %617 = vmatpush.bf16.msra.mxu3 %v578_v0 }
 0x361   :  { %1212 = vmatmul.msk.bf16.gmra.mxu3 %vm43_vm2, %v389_v23 }
 0x371   :  { %1213 = vmatmul.msk.bf16.vlgmr.msra.gmra.mxu3 %vm43_vm2, %v1697_v17 }
 0x381   :  { %1214 = vmatmul.msk.bf16.gmra.mxu3 %vm43_vm2, %v389_v23 }
 0x399   :  { %v850_v45 = vpop.f32.mrf.mxu0  ;;  %v1737_v52 = vpop.f32.mrf.mxu1 }
 0x3a1   :  { %v852_v46 = vpop.f32.mrf.mxu0  ;;  %v1739_v37 = vpop.f32.mrf.mxu1 }
 0x3a9   :  { %v855_v47 = vpop.f32.mrf.mxu0  ;;  %v1741_v2 = vpop.f32.mrf.mxu1 }
 0x3aa   :  { %v899_v49 = vmax.f32 %v850_v45, %v855_v47  ;;  %v912_v3 = vmax.f32 %v1737_v52, %v1741_v2 }
 0x3b1   :  { %v857_v57 = vpop.f32.mrf.mxu0  ;;  %v1743_v60 = vpop.f32.mrf.mxu1 }
 0x3b2   :  { %v900_v6 = vmax.f32 %v852_v46, %v857_v57  ;;  %v913_v7 = vmax.f32 %v1739_v37, %v1743_v60 }
 0x3b9   :  { %v860_v4 = vpop.f32.mrf.mxu0 }
 0x3ba   :  { %v1745_v53 = vpop.f32.mrf.mxu1  ;;  %v901_v8 = vmax.f32 %v899_v49, %v860_v4 }
 0x3bb   :  { %v914_v9 = vmax.f32 %v912_v3, %v1745_v53 }
 0x3c1   :  { %v862_v56 = vpop.f32.mrf.mxu0 }
 0x3c2   :  { %v1747_v62 = vpop.f32.mrf.mxu1  ;;  %v902_v59 = vmax.f32 %v900_v6, %v862_v56 }
 0x3c3   :  { %v915_v10 = vmax.f32 %v913_v7, %v1747_v62  ;;  %v571_v7 = vrot.slane %v1725_v16, 4 }
 0x3c9   :  { %v865_v17 = vpop.f32.mrf.mxu0 }
 0x3ca   :  { %v1749_v48 = vpop.f32.mrf.mxu1  ;;  %v903_v12 = vmax.f32 %v901_v8, %v865_v17 }
 0x3cb   :  { %v916_v1 = vmax.f32 %v914_v9, %v1749_v48 }
 0x3d1   :  { %v867_v61 = vpop.f32.mrf.mxu0 }
 0x3d2   :  { %v1757_v11 = vpop.f32.mrf.mxu1  ;;  %v904_v13 = vmax.f32 %v902_v59, %v867_v61 }
 0x3d3   :  { %v917_v55 = vmax.f32 %v915_v10, %v1757_v11 }
 0x3d4   :  { %v1761_v58 = vpop.f32.mrf.mxu3  ;;  %v905_v14 = vmax.f32 %v903_v12, %v904_v13 }
 0x3d5   :  { %v918_v15 = vmax.f32 %v916_v1, %v917_v55 }
 0x3d6   :  { %v906_v54 = vrot.slane %v905_v14, 4 }
 0x3d7   :  { %v919_v23 = vrot.slane %v918_v15, 4 }
 0x3d8   :  { %v907_v24 = vmax.f32 %v905_v14, %v906_v54 }
 0x3d9   :  { %v920_v5 = vmax.f32 %v918_v15, %v919_v23 }
 0x3da   :  { %v908_v25 = vrot.slane %v907_v24, 2 }
 0x3db   :  { %v921_v26 = vrot.slane %v920_v5, 2 }
 0x3dc   :  { %v1763_v30 = vpop.f32.mrf.mxu3  ;;  %v909_v31 = vmax.f32 %v907_v24, %v908_v25 }
 0x3dd   :  { %v922_v32 = vmax.f32 %v920_v5, %v921_v26 }
 0x3de   :  { %v910_v22 = vrot.slane %v909_v31, 1 }
 0x3df   :  { %v923_v34 = vrot.slane %v922_v32, 1 }
 0x3e0   :  { %v911_v35 = vmax.f32 %v909_v31, %v910_v22 }
 0x3e1   :  { %v1765_v27 = vmax.f32 %v922_v32, %v923_v34 }
 0x3e2   :  { %v925_v21 = vsub.f32 %v850_v45, %v911_v35  ;;  %v927_v28 = vsub.f32 %v852_v46, %v911_v35  ;;  %v929_v36 = vsub.f32 %v855_v47, %v911_v35  ;;  %v931_v38 = vsub.f32 %v857_v57, %v911_v35 }
 0x3e3   :  { %v933_v39 = vsub.f32 %v860_v4, %v911_v35  ;;  %v935_v40 = vsub.f32 %v862_v56, %v911_v35  ;;  %v937_v18 = vsub.f32 %v865_v17, %v911_v35  ;;  %v939_v29 = vsub.f32 %v867_v61, %v911_v35 }
 0x3e4   :  { %v1767_v41 = vpop.f32.mrf.mxu3  ;;  %v941_v19 = vmul.f32 1.442695, %v925_v21  ;;  %v945_v42 = vmul.f32 1.442695, %v927_v28  ;;  %v949_v43 = vmul.f32 1.442695, %v929_v36  ;;  %v926_v63 = vsub.f32 %v1737_v52, %v1765_v27 }
 0x3e5   :  { %v953_v44 = vmul.f32 1.442695, %v931_v38  ;;  %v957_v51 = vmul.f32 1.442695, %v933_v39  ;;  %v961_v0 = vmul.f32 1.442695, %v935_v40  ;;  %v928_v45 = vsub.f32 %v1739_v37, %v1765_v27 }
 0x3e6   :  { %1303 = vpow2.f32 %v941_v19  ;;  %v965_v46 = vmul.f32 1.442695, %v937_v18  ;;  %v969_v47 = vmul.f32 1.442695, %v939_v29  ;;  %v930_v57 = vsub.f32 %v1741_v2, %v1765_v27 }
 0x3e7   :  { %1305 = vpow2.f32 %v945_v42  ;;  %v561_v4 = vadd.f32 %v560_v50, %v559_v20  ;;  %v932_v56 = vsub.f32 %v1743_v60, %v1765_v27  ;;  %v943_v17 = vmul.f32 1.442695, %v926_v63 }
 0x3e8   :  { %1307 = vpow2.f32 %v949_v43  ;;  %v934_v52 = vsub.f32 %v1745_v53, %v1765_v27  ;;  %v947_v49 = vmul.f32 1.442695, %v928_v45  ;;  %v938_v6 = vsub.f32 %v1749_v48, %v1765_v27 }
 0x3e9   :  { %1309 = vpow2.f32 %v953_v44  ;;  %v940_v60 = vsub.f32 %v1757_v11, %v1765_v27  ;;  %v951_v8 = vmul.f32 1.442695, %v930_v57  ;;  %v562_v53 = vrot.slane %v561_v4, 1 }
 0x3ea   :  { %1311 = vpow2.f32 %v957_v51  ;;  %v955_v10 = vmul.f32 1.442695, %v932_v56  ;;  %v936_v48 = vsub.f32 %v1747_v62, %v1765_v27  ;;  %v959_v12 = vmul.f32 1.442695, %v934_v52 }
 0x3eb   :  { %1313 = vpow2.f32 %v961_v0  ;;  %v967_v55 = vmul.f32 1.442695, %v938_v6  ;;  %v572_v11 = vadd.f32 %v571_v7, %v1725_v16  ;;  %v971_v15 = vmul.f32 1.442695, %v940_v60  ;;  %v1010_v7 = vpop.permute.xlu2 %1009 }
 0x3ec   :  { %v1779_v3 = vpop.f32.mrf.mxu3  ;;  %v1781_v37 = vpop.eup %1303  ;;  %1315 = vpow2.f32 %v965_v46  ;;  %v563_v23 = vadd.f32 %v562_v53, %v561_v4  ;;  %v963_v25 = vmul.f32 1.442695, %v936_v48  ;;  %v240_v48 = vld [vmem:[%s1821_s3] sm:$0xf]  ;;  %s1371_s3 = smov [#allocation3]  }
 0x3ed   :  { %v1785_v2 = vpop.eup %1305  ;;  %1317 = vpow2.f32 %v969_v47  ;;  %v573_v22 = vrot.slane %v572_v11, 2  ;;  %s1177_s21 = sshll.u32 %s1371_s3, 4  ;;  %s1178_s21 = int_to_ptr.vmem [resolvable:$true] %s1177_s21 }
 0x3ee   :  { %v1308_v9 = vpop.eup %1307  ;;  %v973_v59 = vadd.f32 %v1785_v2, %v1781_v37  ;;  %1319 = vpow2.f32 %v943_v17  ;;  %v999_v4 = vpack.c.bf16 %v1785_v2, %v1781_v37 }
 0x3ef   :  { %v1310_v61 = vpop.eup %1309  ;;  %1321 = vpow2.f32 %v947_v49  ;;  %v574_v38 = vadd.f32 %v573_v22, %v572_v11 }
 0x3f0   :  { %v1312_v1 = vpop.eup %1311  ;;  %v974_v13 = vadd.f32 %v1308_v9, %v973_v59  ;;  %1323 = vpow2.f32 %v951_v8  ;;  %v1001_v50 = vpack.c.bf16 %v1310_v61, %v1308_v9 }
 0x3f1   :  { %v1314_v14 = vpop.eup %1313  ;;  %1325 = vpow2.f32 %v955_v10  ;;  %v575_v63 = vrot.slane %v574_v38, 1 }
 0x3f2   :  { %v1316_v54 = vpop.eup %1315  ;;  %v975_v24 = vadd.f32 %v1310_v61, %v974_v13  ;;  %1327 = vpow2.f32 %v959_v12  ;;  %v1003_v28 = vpack.c.bf16 %v1314_v14, %v1312_v1  ;;  %v241_v12 = vpack.c.bf16 %v240_v48, %v240_v48 }
 0x3f3   :  { %v1318_v5 = vpop.eup %1317  ;;  %1329 = vpow2.f32 %v967_v55  ;;  %v576_v56 = vadd.f32 %v575_v63, %v574_v38  ;;  %v1012_v61 = vpop.permute.xlu2 %1011 }
 0x3f4   :  { %v1795_v26 = vpop.f32.mrf.mxu3  ;;  %v1320_v62 = vpop.eup %1319  ;;  %v976_v31 = vadd.f32 %v1312_v1, %v975_v24  ;;  %v1005_v32 = vpack.c.bf16 %v1318_v5, %v1316_v54  ;;  %1331 = vpow2.f32 %v971_v15 }
 0x3f5   :  { %v1322_v33 = vpop.eup %1321  ;;  %1333 = vrcp.f32 %v563_v23 }
 0x3f6   :  { %v977_v16 = vadd.f32 %v1314_v14, %v976_v31  ;;  %v986_v34 = vadd.f32 %v1322_v33, %v1320_v62  ;;  %1023 = vmatpush.bf16.msra.mxu2 %v1005_v32  ;;  %v1324_v35 = vpop.eup %1323  ;;  %1335 = vpow2.f32 %v963_v25  ;;  %v1000_v37 = vpack.c.bf16 %v1322_v33, %v1320_v62 }
 0x3f7   :  { %v1326_v20 = vpop.eup %1325  ;;  %1337 = vrcp.f32 %v576_v56 }
 0x3f8   :  { %v978_v27 = vadd.f32 %v1316_v54, %v977_v16  ;;  %v987_v21 = vadd.f32 %v1324_v35, %v986_v34  ;;  %v1328_v36 = vpop.eup %1327  ;;  %v1002_v60 = vpack.c.bf16 %v1326_v20, %v1324_v35 }
 0x3f9   :  { %v1330_v39 = vpop.eup %1329 }
 0x3fa   :  { %v979_v40 = vadd.f32 %v1318_v5, %v978_v27  ;;  %v988_v18 = vadd.f32 %v1326_v20, %v987_v21  ;;  %1024 = vmatpush.bf16.msra.mxu2 %v1003_v28  ;;  %v1332_v19 = vpop.eup %1331 }
 0x3fb   :  { %v1334_v43 = vpop.eup %1333  ;;  %v1006_v44 = vpack.c.bf16 %v1332_v19, %v1330_v39 }
 0x3fc   :  { %v621_v42 = vpop.f32.mrf.mxu3  ;;  %v989_v29 = vadd.f32 %v1328_v36, %v988_v18  ;;  %v1336_v51 = vpop.eup %1335  ;;  %v637_v0 = vmul.f32 %v1334_v43, %v1779_v3  ;;  %v635_v46 = vmul.f32 %v1334_v43, %v1767_v41  ;;  %v633_v17 = vmul.f32 %v1334_v43, %v1763_v30 }
 0x3fd   :  { %1042 = vmatpush.bf16.msrb.mxu3 %v1006_v44  ;;  %v1004_v57 = vpack.c.bf16 %v1336_v51, %v1328_v36  ;;  %v631_v6 = vmul.f32 %v1334_v43, %v1761_v58  ;;  %v1338_v2 = vpop.eup %1337  ;;  %v980_v1 = vrot.slane %v979_v40, 4 }
 0x3fe   :  { %v990_v45 = vadd.f32 %v1336_v51, %v989_v29  ;;  %1025 = vmatpush.bf16.msra.mxu2 %v1001_v50  ;;  %v1095_v52 = vpack.c.bf16 %v637_v0, %v635_v46  ;;  %v634_v53 = vmul.f32 %v1338_v2, %v621_v42  ;;  %v632_v59 = vmul.f32 %v1338_v2, %v1795_v26 }
 0x3ff   :  { %v1091_v41 = vpack.c.bf16 %v633_v17, %v631_v6  ;;  %v981_v13 = vadd.f32 %v980_v1, %v979_v40  ;;  %v1370_v26 = vmov 32  }
 0x400   :  { %v991_v47 = vadd.f32 %v1330_v39, %v990_v45  ;;  %v1092_v10 = vpack.c.bf16 %v634_v53, %v632_v59  ;;  %1237 = vset.pattern.permute.xlu2 %v1370_v26  ;;  %1238 = vset.pattern.permute.xlu0 %v1370_v26 }
 0x401   :  { %1043 = vmatpush.bf16.msrb.mxu3 %v1004_v57  ;;  %v982_v14 = vrot.slane %v981_v13, 2  ;;  %1101 = vperm.xlu2 %1237, %v240_v48  }
 0x402   :  { %v992_v49 = vadd.f32 %v1332_v19, %v991_v47  ;;  %1026 = vmatpush.bf16.msra.mxu2 %v999_v4 }
 0x403   :  { %v983_v15 = vadd.f32 %v982_v14, %v981_v13 }
 0x404   :  { %v624_v3 = vpop.f32.mrf.mxu3  ;;  %v993_v11 = vrot.slane %v992_v49, 4 }
 0x405   :  { %1223 = vmatmul.msk.bf16.vlgmr.msra.gmra.mxu2 %vm43_vm2, %v1010_v7  ;;  %1044 = vmatpush.bf16.msrb.mxu3 %v1002_v60  ;;  %v636_v8 = vmul.f32 %v1338_v2, %v624_v3  ;;  %v984_v5 = vrot.slane %v983_v15, 1 }
 0x406   :  { %1113 = vmatpush.bf16.msrb.mxu2 %v1095_v52  ;;  %v994_v54 = vadd.f32 %v993_v11, %v992_v49 }
 0x407   :  { %v985_v62 = vadd.f32 %v984_v5, %v983_v15 }
 0x408   :  { %v995_v25 = vrot.slane %v994_v54, 2 }
 0x409   :  { %1045 = vmatpush.bf16.msrb.mxu3 %v1000_v37  ;;  %1339 = vrcp.f32 %v985_v62 }
 0x40a   :  { %1114 = vmatpush.bf16.msrb.mxu2 %v1091_v41  ;;  %v996_v31 = vadd.f32 %v995_v25, %v994_v54 }
 0x40c   :  { %v626_v30 = vpop.f32.mrf.mxu3  ;;  %1225 = vmatmul.msk.bf16.vlgmr.msrb.gmra.mxu3 %vm43_vm2, %v1010_v7  ;;  %v997_v22 = vrot.slane %v996_v31, 1 }
 0x40d   :  { %v638_v9 = vmul.f32 %v1338_v2, %v626_v30 }
 0x40e   :  { %v998_v16 = vadd.f32 %v997_v22, %v996_v31 }
 0x40f   :  { %v1096_v58 = vpack.c.bf16 %v638_v9, %v636_v8  ;;  %v1340_v34 = vpop.eup %1339 }
 0x410   :  { %1341 = vrcp.f32 %v998_v16 }
 0x411   :  { %1126 = vmatpush.bf16.msra.mxu3 %v1096_v58 }
 0x415   :  { %1127 = vmatpush.bf16.msra.mxu3 %v1092_v10  ;;  %1224 = vmatmul.msk.bf16.gmra.mxu2 %vm43_vm2, %v1012_v61 }
 0x416   :  { %v1342_v40 = vpop.eup %1341 }
 0x41c   :  { %1226 = vmatmul.msk.bf16.gmra.mxu3 %vm43_vm2, %v1012_v61 }
 0x425   :  { %1227 = vmatmul.msk.bf16.vlgmr.msrb.gmra.mxu2 %vm406_vm9, %v241_v12 }
 0x42c   :  { %1228 = vmatmul.msk.bf16.vlgmr.msra.gmra.mxu3 %vm406_vm9, %v241_v12 }
 0x45b   :  { %v1102_v51 = vpop.permute.xlu2 %1101 }
 0x488   :  { %v1028_v55 = vpop.f32.mrf.mxu2 }
 0x489   :  { %v1059_v38 = vmul.f32 %v1340_v34, %v1028_v55 }
 0x48f   :  { %v1047_v23 = vpop.f32.mrf.mxu3 }
 0x490   :  { %v1030_v24 = vpop.f32.mrf.mxu2  ;;  %v1060_v44 = vmul.f32 %v1342_v40, %v1047_v23 }
 0x491   :  { %v1061_v28 = vmul.f32 %v1340_v34, %v1030_v24 }
 0x493   :  { %v1093_v39 = vpack.c.bf16 %v1061_v28, %v1059_v38 }
 0x497   :  { %v1049_v32 = vpop.f32.mrf.mxu3 }
 0x498   :  { %v1033_v33 = vpop.f32.mrf.mxu2  ;;  %v1062_v43 = vmul.f32 %v1342_v40, %v1049_v32 }
 0x499   :  { %v1063_v27 = vmul.f32 %v1340_v34, %v1033_v33 }
 0x49a   :  { %v1094_v50 = vpack.c.bf16 %v1062_v43, %v1060_v44 }
 0x49f   :  { %v1052_v35 = vpop.f32.mrf.mxu3 }
 0x4a0   :  { %v1035_v20 = vpop.f32.mrf.mxu2  ;;  %v1064_v19 = vmul.f32 %v1342_v40, %v1052_v35 }
 0x4a1   :  { %v1065_v21 = vmul.f32 %v1340_v34, %v1035_v20 }
 0x4a3   :  { %v1097_v36 = vpack.c.bf16 %v1065_v21, %v1063_v27 }
 0x4a5   :  { %1139 = vmatpush.bf16.msra.mxu2 %v1097_v36 }
 0x4a7   :  { %v1054_v18 = vpop.f32.mrf.mxu3 }
 0x4a8   :  { %v1066_v42 = vmul.f32 %v1342_v40, %v1054_v18  ;;  %v1116_v63 = vpop.f32.mrf.mxu2 }
 0x4a9   :  { %1140 = vmatpush.bf16.msra.mxu2 %v1093_v39  ;;  %v1117_v46 = vadd.f32 %v1116_v63, %v1102_v51 }
 0x4aa   :  { %v1098_v29 = vpack.c.bf16 %v1066_v42, %v1064_v19 }
 0x4ac   :  { %1229 = vmatmul.msk.bf16.vlgmr.msra.gmra.mxu2 %vm406_vm9, %v241_v12  ;;  %1152 = vmatpush.bf16.msrb.mxu3 %v1098_v29 }
 0x4af   :  { %v1129_v0 = vpop.f32.mrf.mxu3 }
 0x4b0   :  { %1153 = vmatpush.bf16.msrb.mxu3 %v1094_v50  ;;  %v1130_v45 = vadd.f32 %v1129_v0, %v1102_v51  ;;  %v1118_v57 = vpop.f32.mrf.mxu2 }
 0x4b2   :  { %v1161_v47 = vrot.slane %v1130_v45, 4 }
 0x4b3   :  { %1230 = vmatmul.msk.bf16.vlgmr.msrb.gmra.mxu3 %vm406_vm9, %v241_v12 }
 0x4b4   :  { %v1163_v56 = vsel %vm1162_vm1, %v1117_v46, %v1161_v47 }
 0x4b5   :  { %1165 = vst [vmem:[#allocation3] sm:$0xff] %v1163_v56 }
 0x4b7   :  { %v1131_v4 = vpop.f32.mrf.mxu3 }
 0x52f   :  { %v1142_v17 = vpop.f32.mrf.mxu2 }
 0x530   :  { %v1143_v3 = vadd.f32 %v1142_v17, %v1102_v51 }
 0x536   :  { %v1155_v52 = vpop.f32.mrf.mxu3 }
 0x537   :  { %v1144_v49 = vpop.f32.mrf.mxu2  ;;  %v1156_v6 = vadd.f32 %v1155_v52, %v1102_v51 }
 0x539   :  { %v1168_v7 = vrot.slane %v1156_v6, 4 }
 0x53b   :  { %v1169_v60 = vsel %vm1162_vm1, %v1143_v3, %v1168_v7 }
 0x53c   :  { %1172 = vst [vmem:[#allocation3 + $0x8] sm:$0xff] %v1169_v60 }
 0x53d   :  { %1185 = dma.vmem_to_hbm [thread:$0]  %s1178_s21, 256, %s1180_s24, [#allocation4], %s1372_s25, %s1372_s25, %s1373_s0  }
 0x53e   :  { %v1157_v41 = vpop.f32.mrf.mxu3 }
 0x53f   :  { %1367 = dma.done.wait [#allocation4], 256  }
 0x540   :  { %1368 = vsyncadd [#allocation4], 4294967040 }
 0x541   :  { %1190 = vsyncpa [#allocation4], 1 }

</bundles_post_ra>
